<compile_context>
chip_gen: v5e
topology: v5e:2x2
jax: 0.10.0
libtpu: 0.0.40
codegen_flags: <defaults>
</compile_context>

<pallas_src>
import math

import jax
import jax.numpy as jnp
from jax.experimental import pallas as pl
from jax.experimental.pallas import tpu as pltpu

LN_EPS = 1e-5   # PyTorch nn.LayerNorm default


# ---------------------------------------------------------------------------
# In-kernel building blocks
# ---------------------------------------------------------------------------
def _linear_layernorm(x, w, b, gamma, beta):
    """Batched channel-first Linear + LayerNorm over channels.

    x:      (G, C, S) slabs; channels on the sublane axis, S on the lane axis.
    w:      (C, C) in PyTorch (out, in) layout, consumed as-is.
    b, gamma, beta: (C, 1) columns (lane-broadcast).
    Returns (G, C, S) float32.

    The tiny weight is broadcast across the G slabs so the contraction lowers
    to a single batched dot_general (batch g, contract C) with no in-kernel
    transposes.  All math stays in f32.
    """
    g = x.shape[0]
    w32 = w.astype(jnp.float32)
    wb = jnp.broadcast_to(w32[None], (g,) + w32.shape)            # (G, C, C), hoisted once
    y = jax.lax.dot_general(wb, x, (((2,), (1,)), ((0,), (0,))),
                            preferred_element_type=jnp.float32)   # (G, C, S)
    y = y + b[None]
    mu = jnp.mean(y, axis=1, keepdims=True)                       # (G, 1, S)
    var = jnp.mean((y - mu) * (y - mu), axis=1, keepdims=True)
    y_hat = (y - mu) * jax.lax.rsqrt(var + LN_EPS)
    return y_hat * gamma[None] + beta[None]


def _projection_kernel(x_ref, wp_ref, bp_ref, gp_ref, betap_ref, o_ref):
    """Fast path: softmax row-sum == 1, so only the projection branch matters."""
    x = x_ref[...].astype(jnp.float32)                            # (G, C, S)
    o_ref[...] = _linear_layernorm(
        x, wp_ref[...], bp_ref[...], gp_ref[...], betap_ref[...]
    ).astype(o_ref.dtype)


def _full_attention_kernel(x_ref,
                           wq_ref, bq_ref, gq_ref, betaq_ref,
                           wk_ref, bk_ref, gk_ref, betak_ref,
                           wp_ref, bp_ref, gp_ref, betap_ref,
                           o_ref):
    """Faithful path: full query/key/softmax math on a block of G (C, S) slabs."""
    x = x_ref[...].astype(jnp.float32)                            # (G, C, S)

    # query / key: Linear + LayerNorm over C (Dropout = identity in eval).
    # 1/scaling is pre-folded into gq/betaq on the host (no per-step divide).
    q = _linear_layernorm(x, wq_ref[...], bq_ref[...], gq_ref[...], betaq_ref[...])
    k = _linear_layernorm(x, wk_ref[...], bk_ref[...], gk_ref[...], betak_ref[...])

    # einsum('b o c s, b o m s -> b o c m'): batched over slabs, contract S.
    atten = jax.lax.dot_general(q, k, (((2,), (2,)), ((0,), (0,))),
                                preferred_element_type=jnp.float32)   # (G, C, C)

    # softmax over the last dim.  The divide is an EUP approximate reciprocal
    # refined with one Newton step (divide-free, ~f32-exact).
    a_max = jnp.max(atten, axis=-1, keepdims=True)
    a_exp = jnp.exp(atten - a_max)
    a_den = jnp.sum(a_exp, axis=-1, keepdims=True)
    inv = pl.reciprocal(a_den, approx=True)
    inv = inv * (2.0 - a_den * inv)                               # Newton refinement
    score = a_exp * inv                                           # (G, C, C)

    # einsum('b o c s, b o c m -> b o c s'): m is summed out of score (== 1).
    out_cs = x * jnp.sum(score, axis=-1, keepdims=True)           # (G, C, S)

    o_ref[...] = _linear_layernorm(
        out_cs, wp_ref[...], bp_ref[...], gp_ref[...], betap_ref[...]
    ).astype(o_ref.dtype)


# ---------------------------------------------------------------------------
# Per-generation sizing
# ---------------------------------------------------------------------------
def _tpu_budget(user_budget=None):
    """(block_budget_bytes, vmem_limit_bytes, num_tensorcores) for this chip.

    v7x : 64 MiB VMEM, 2 TCs  -> ~16 MiB block budget, 32 MiB scoped limit.
    v6e : 128 MiB VMEM, 1 TC  -> ~32 MiB block budget, 64 MiB scoped limit.
    v5e : 128 MiB VMEM, 1 TC  -> same as v6e (explicit limit matters: scoped
          default there is only 16 MiB).
    Conservative (v7x-like) fallbacks if the hardware query is unavailable.
    """
    vmem_physical = 64 << 20
    num_cores = 1
    try:
        info = pltpu.get_tpu_info()
        vmem_physical = int(getattr(info, "vmem_capacity_bytes", vmem_physical))
        for name in ("num_cores", "tensorcore_count", "num_tensorcores",
                     "cores_per_chip"):
            val = getattr(info, name, None)
            if val:
                num_cores = int(val)
                break
    except Exception:
        pass
    try:
        if "v7" in jax.devices()[0].device_kind.lower():
            num_cores = max(num_cores, 2)
    except Exception:
        pass
    vmem_limit = (32 << 20) if vmem_physical <= (64 << 20) else (64 << 20)
    budget = user_budget if user_budget is not None else max(vmem_physical // 4, 8 << 20)
    budget = min(budget, vmem_limit - (8 << 20))
    return budget, vmem_limit, num_cores


def _choose_group(n_slabs, budget_bytes, bytes_per_slab, num_cores):
    """Largest slab-group G that fits the VMEM budget, divides n_slabs, and (on
    multi-TensorCore chips) keeps >= 2 grid steps per core so each core still
    double-buffers its DMAs.  On single-core chips no halving is applied."""
    g = max(1, budget_bytes // max(1, bytes_per_slab))
    g = min(g, n_slabs)
    if num_cores > 1:
        g = min(g, max(1, n_slabs // (2 * num_cores)))
    while n_slabs % g:
        g -= 1
    return g


# ---------------------------------------------------------------------------
# Wrapper
# ---------------------------------------------------------------------------
def channel_attention_pallas(x, params, *, sequence_num=200, inter=30,
                             exploit_identity_softmax=False,
                             vmem_block_budget_bytes=None):
    """x: (B, O, C, S).  params: dict of weights (see init_params).

    Output matches the PyTorch module's eval-mode forward, layout (B, O, C, S).
    Works for any S; stores are lane-dense (unmasked) when S % 128 == 0.
    """
    B, O, C, S = x.shape
    M = B * O
    x_flat = x.reshape(M, C, S)            # free reshape (leading dims only)

    block_budget, vmem_limit, num_cores = _tpu_budget(vmem_block_budget_bytes)

    def col(v):                            # (C,) -> (C, 1) lane-broadcast column
        return v.reshape(C, 1).astype(jnp.float32)

    # Weight / affine operands have constant index maps; they are a few KiB so
    # their default double-buffering is noise (pipeline_mode=pl.Buffered(1)
    # could trim it further but is omitted to keep the lowering portable).
    w_spec = pl.BlockSpec((C, C), lambda i: (0, 0))
    v_spec = pl.BlockSpec((C, 1), lambda i: (0, 0))

    compiler_params = pltpu.CompilerParams(
        dimension_semantics=("parallel",),
        vmem_limit_bytes=vmem_limit,
    )

    slab_io = C * S * 4                    # one f32 (C, S) slab

    if exploit_identity_softmax:
        # ---- fast path: projection only, native layout, multi-slab blocks ----
        # Per slab: in + out blocks (both double-buffered -> 4 copies) plus the
        # broadcast weight copy.
        g = _choose_group(M, block_budget, 4 * slab_io + 4 * C * C, num_cores)
        blk = pl.BlockSpec((g, C, S), lambda i: (i, 0, 0))

        out_flat = pl.pallas_call(
            _projection_kernel,
            out_shape=jax.ShapeDtypeStruct((M, C, S), x.dtype),
            grid=(M // g,),
            in_specs=[blk, w_spec, v_spec, v_spec, v_spec],
            out_specs=blk,
            compiler_params=compiler_params,
        )(x_flat, params["wp"], col(params["bp"]),
          col(params["gp"]), col(params["betap"]))
        return out_flat.reshape(B, O, C, S)

    # ---- faithful path (default): full attention math, multi-slab blocks ----
    extract_sequence = int(sequence_num / inter)
    scaling = float(extract_sequence ** 0.5)

    # Per slab: in/out double-buffered (4 copies) + ~6 block-sized f32 live
    # intermediates (q, k, out_cs, LN temps) + attention matrices + broadcast
    # weights.
    g = _choose_group(M, block_budget, 10 * slab_io + 16 * C * C, num_cores)
    blk = pl.BlockSpec((g, C, S), lambda i: (i, 0, 0))

    out_flat = pl.pallas_call(
        _full_attention_kernel,
        out_shape=jax.ShapeDtypeStruct((M, C, S), x.dtype),
        grid=(M // g,),
        in_specs=[
            blk,
            w_spec, v_spec, v_spec, v_spec,   # query
            w_spec, v_spec, v_spec, v_spec,   # key
            w_spec, v_spec, v_spec, v_spec,   # projection
        ],
        out_specs=blk,
        compiler_params=compiler_params,
    )(
        x_flat,
        params["wq"], col(params["bq"]),
        col(params["gq"]) / scaling, col(params["betaq"]) / scaling,  # fold 1/scaling into q's affine
        params["wk"], col(params["bk"]), col(params["gk"]), col(params["betak"]),
        params["wp"], col(params["bp"]), col(params["gp"]), col(params["betap"]),
    )
    return out_flat.reshape(B, O, C, S)


# ---------------------------------------------------------------------------
# Params + pure-JAX reference
# ---------------------------------------------------------------------------
def init_params(key, C):
    """xavier_normal_ linear weights, zero biases, LayerNorm gamma=1 / beta=0."""
    kq, kk, kp = jax.random.split(key, 3)
    std = math.sqrt(2.0 / (C + C))  # xavier normal, gain=1, fan_in=fan_out=C
    mk_w = lambda k: (std * jax.random.normal(k, (C, C))).astype(jnp.float32)
    zeros = jnp.zeros((C,), jnp.float32)
    ones = jnp.ones((C,), jnp.float32)
    return {
        "wq": mk_w(kq), "bq": zeros, "gq": ones, "betaq": zeros,
        "wk": mk_w(kk), "bk": zeros, "gk": ones, "betak": zeros,
        "wp": mk_w(kp), "bp": zeros, "gp": ones, "betap": zeros,
    }


def channel_attention_ref(x, params, *, sequence_num, inter):
    """Pure-JAX reference mirroring the PyTorch forward (eval mode)."""
    extract_sequence = int(sequence_num / inter)
    scaling = extract_sequence ** 0.5

    def lin_ln(t, w, b, g, beta):
        y = jnp.einsum("bosc,dc->bosd", t, w) + b
        mu = jnp.mean(y, axis=-1, keepdims=True)
        var = jnp.mean((y - mu) ** 2, axis=-1, keepdims=True)
        return (y - mu) / jnp.sqrt(var + LN_EPS) * g + beta

    temp = jnp.swapaxes(x, -1, -2)                                        # (B,O,S,C)
    q = jnp.swapaxes(lin_ln(temp, params["wq"], params["bq"], params["gq"], params["betaq"]), -1, -2)
    k = jnp.swapaxes(lin_ln(temp, params["wk"], params["bk"], params["gk"], params["betak"]), -1, -2)
    atten = jnp.einsum("bocs,boms->bocm", q, k) / scaling
    score = jax.nn.softmax(atten, axis=-1)
    out = jnp.einsum("bocs,bocm->bocs", x, score)
    out = jnp.swapaxes(out, -1, -2)
    out = lin_ln(out, params["wp"], params["bp"], params["gp"], params["betap"])
    return jnp.swapaxes(out, -1, -2)


if __name__ == "__main__":
    # Small shapes consistent with the forward: (B, O, C, S).
    # S=128 keeps the kernel's stores lane-dense; production C is 271.
    B, O, C, S = 2, 4, 16, 128
    sequence_num, inter = 200, 30   # module defaults -> extract_sequence = 6

    key = jax.random.PRNGKey(0)
    kx, kp = jax.random.split(key)
    x = jax.random.normal(kx, (B, O, C, S), dtype=jnp.float32)
    params = init_params(kp, C)

    ref = channel_attention_ref(x, params, sequence_num=sequence_num, inter=inter)

    # Faithful path (default): full query/key/softmax math, batched slabs.
    out_full = channel_attention_pallas(x, params, sequence_num=sequence_num, inter=inter)
    out_full = jax.block_until_ready(out_full)
    assert out_full.shape == (B, O, C, S)
    assert jnp.allclose(out_full, ref, atol=1e-4, rtol=1e-4), "faithful path mismatch vs reference"

    # Fast path: exploits softmax row-sum == 1, projection only.
    out_fast = channel_attention_pallas(
        x, params, sequence_num=sequence_num, inter=inter,
        exploit_identity_softmax=True)
    out_fast = jax.block_until_ready(out_fast)
    assert out_fast.shape == (B, O, C, S)
    assert jnp.allclose(out_fast, ref, atol=1e-4, rtol=1e-4), "fast path mismatch vs reference"

    print("KERNEL_OK")
</pallas_src>

<mosaic_0001>
module attributes {stable_mosaic.version = 11 : i64} {
  func.func @_full_attention_kernel(%arg0: i32, %arg1: memref<8x16x128xf32, #tpu.memory_space<vmem>>, %arg2: memref<16x16xf32, #tpu.memory_space<vmem>>, %arg3: memref<16x1xf32, #tpu.memory_space<vmem>>, %arg4: memref<16x1xf32, #tpu.memory_space<vmem>>, %arg5: memref<16x1xf32, #tpu.memory_space<vmem>>, %arg6: memref<16x16xf32, #tpu.memory_space<vmem>>, %arg7: memref<16x1xf32, #tpu.memory_space<vmem>>, %arg8: memref<16x1xf32, #tpu.memory_space<vmem>>, %arg9: memref<16x1xf32, #tpu.memory_space<vmem>>, %arg10: memref<16x16xf32, #tpu.memory_space<vmem>>, %arg11: memref<16x1xf32, #tpu.memory_space<vmem>>, %arg12: memref<16x1xf32, #tpu.memory_space<vmem>>, %arg13: memref<16x1xf32, #tpu.memory_space<vmem>>, %arg14: memref<8x16x128xf32, #tpu.memory_space<vmem>>) attributes {dimension_semantics = [#tpu.dimension_semantics<parallel>], iteration_bounds = array<i64: 1>, scalar_prefetch = 0 : i64, scratch_operands = 0 : i64, tpu.core_type = #tpu.core_type<tc>, window_params = [{transform_indices = @transform_0, window_bounds = array<i64: 8, 16, 128>}, {pipeline_mode = #tpu.pipeline_mode<synchronous>, transform_indices = @transform_1, window_bounds = array<i64: 16, 16>}, {pipeline_mode = #tpu.pipeline_mode<synchronous>, transform_indices = @transform_2, window_bounds = array<i64: 16, 1>}, {pipeline_mode = #tpu.pipeline_mode<synchronous>, transform_indices = @transform_3, window_bounds = array<i64: 16, 1>}, {pipeline_mode = #tpu.pipeline_mode<synchronous>, transform_indices = @transform_4, window_bounds = array<i64: 16, 1>}, {pipeline_mode = #tpu.pipeline_mode<synchronous>, transform_indices = @transform_5, window_bounds = array<i64: 16, 16>}, {pipeline_mode = #tpu.pipeline_mode<synchronous>, transform_indices = @transform_6, window_bounds = array<i64: 16, 1>}, {pipeline_mode = #tpu.pipeline_mode<synchronous>, transform_indices = @transform_7, window_bounds = array<i64: 16, 1>}, {pipeline_mode = #tpu.pipeline_mode<synchronous>, transform_indices = @transform_8, window_bounds = array<i64: 16, 1>}, {pipeline_mode = #tpu.pipeline_mode<synchronous>, transform_indices = @transform_9, window_bounds = array<i64: 16, 16>}, {pipeline_mode = #tpu.pipeline_mode<synchronous>, transform_indices = @transform_10, window_bounds = array<i64: 16, 1>}, {pipeline_mode = #tpu.pipeline_mode<synchronous>, transform_indices = @transform_11, window_bounds = array<i64: 16, 1>}, {pipeline_mode = #tpu.pipeline_mode<synchronous>, transform_indices = @transform_12, window_bounds = array<i64: 16, 1>}, {transform_indices = @transform_13, window_bounds = array<i64: 8, 16, 128>}]} {
    %c0 = arith.constant 0 : index
    %c0_0 = arith.constant 0 : index
    %c0_1 = arith.constant 0 : index
    %0 = vector.load %arg1[%c0, %c0_0, %c0_1] : memref<8x16x128xf32, #tpu.memory_space<vmem>>, vector<8x16x128xf32>
    %c0_2 = arith.constant 0 : index
    %c0_3 = arith.constant 0 : index
    %1 = vector.load %arg2[%c0_2, %c0_3] : memref<16x16xf32, #tpu.memory_space<vmem>>, vector<16x16xf32>
    %c0_4 = arith.constant 0 : index
    %c0_5 = arith.constant 0 : index
    %2 = vector.load %arg3[%c0_4, %c0_5] : memref<16x1xf32, #tpu.memory_space<vmem>>, vector<16x1xf32>
    %c0_6 = arith.constant 0 : index
    %c0_7 = arith.constant 0 : index
    %3 = vector.load %arg4[%c0_6, %c0_7] : memref<16x1xf32, #tpu.memory_space<vmem>>, vector<16x1xf32>
    %c0_8 = arith.constant 0 : index
    %c0_9 = arith.constant 0 : index
    %4 = vector.load %arg5[%c0_8, %c0_9] : memref<16x1xf32, #tpu.memory_space<vmem>>, vector<16x1xf32>
    %5 = vector.shape_cast %1 : vector<16x16xf32> to vector<1x16x16xf32>
    %6 = vector.shape_cast %5 : vector<1x16x16xf32> to vector<1x16x16xf32>
    %7 = vector.broadcast %6 : vector<1x16x16xf32> to vector<8x16x16xf32>
    %cst = arith.constant dense<0.000000e+00> : vector<8x16x128xf32>
    %8 = tpu.matmul %7, %0, %cst {dimension_numbers = #tpu.dot_dimension_numbers<[2], [1], [1], [2], [0, 0, 0, 1, 1, 2], [0], [0]>} : vector<8x16x16xf32>, vector<8x16x128xf32>, vector<8x16x128xf32> -> vector<8x16x128xf32>
    %9 = vector.shape_cast %2 : vector<16x1xf32> to vector<1x16x1xf32>
    %10 = vector.broadcast %9 : vector<1x16x1xf32> to vector<8x16x128xf32>
    %11 = arith.addf %8, %10 : vector<8x16x128xf32>
    %cst_10 = arith.constant dense<0.000000e+00> : vector<8x128xf32>
    %12 = vector.multi_reduction <add>, %11, %cst_10 [1] : vector<8x16x128xf32> to vector<8x128xf32>
    %13 = vector.shape_cast %12 : vector<8x128xf32> to vector<8x1x128xf32>
    %cst_11 = arith.constant 1.600000e+01 : f32
    %14 = vector.broadcast %cst_11 : f32 to vector<8x1x128xf32>
    %15 = arith.divf %13, %14 : vector<8x1x128xf32>
    %16 = vector.broadcast %15 : vector<8x1x128xf32> to vector<8x16x128xf32>
    %17 = arith.subf %11, %16 : vector<8x16x128xf32>
    %18 = vector.broadcast %15 : vector<8x1x128xf32> to vector<8x16x128xf32>
    %19 = arith.subf %11, %18 : vector<8x16x128xf32>
    %20 = arith.mulf %17, %19 : vector<8x16x128xf32>
    %cst_12 = arith.constant dense<0.000000e+00> : vector<8x128xf32>
    %21 = vector.multi_reduction <add>, %20, %cst_12 [1] : vector<8x16x128xf32> to vector<8x128xf32>
    %22 = vector.shape_cast %21 : vector<8x128xf32> to vector<8x1x128xf32>
    %cst_13 = arith.constant 1.600000e+01 : f32
    %23 = vector.broadcast %cst_13 : f32 to vector<8x1x128xf32>
    %24 = arith.divf %22, %23 : vector<8x1x128xf32>
    %25 = vector.broadcast %15 : vector<8x1x128xf32> to vector<8x16x128xf32>
    %26 = arith.subf %11, %25 : vector<8x16x128xf32>
    %cst_14 = arith.constant 9.99999974E-6 : f32
    %27 = vector.broadcast %cst_14 : f32 to vector<8x1x128xf32>
    %28 = arith.addf %24, %27 : vector<8x1x128xf32>
    %29 = math.rsqrt %28 : vector<8x1x128xf32>
    %30 = vector.broadcast %29 : vector<8x1x128xf32> to vector<8x16x128xf32>
    %31 = arith.mulf %26, %30 : vector<8x16x128xf32>
    %32 = vector.shape_cast %3 : vector<16x1xf32> to vector<1x16x1xf32>
    %33 = vector.broadcast %32 : vector<1x16x1xf32> to vector<8x16x128xf32>
    %34 = arith.mulf %31, %33 : vector<8x16x128xf32>
    %35 = vector.shape_cast %4 : vector<16x1xf32> to vector<1x16x1xf32>
    %36 = vector.broadcast %35 : vector<1x16x1xf32> to vector<8x16x128xf32>
    %37 = arith.addf %34, %36 : vector<8x16x128xf32>
    %c0_15 = arith.constant 0 : index
    %c0_16 = arith.constant 0 : index
    %38 = vector.load %arg6[%c0_15, %c0_16] : memref<16x16xf32, #tpu.memory_space<vmem>>, vector<16x16xf32>
    %c0_17 = arith.constant 0 : index
    %c0_18 = arith.constant 0 : index
    %39 = vector.load %arg7[%c0_17, %c0_18] : memref<16x1xf32, #tpu.memory_space<vmem>>, vector<16x1xf32>
    %c0_19 = arith.constant 0 : index
    %c0_20 = arith.constant 0 : index
    %40 = vector.load %arg8[%c0_19, %c0_20] : memref<16x1xf32, #tpu.memory_space<vmem>>, vector<16x1xf32>
    %c0_21 = arith.constant 0 : index
    %c0_22 = arith.constant 0 : index
    %41 = vector.load %arg9[%c0_21, %c0_22] : memref<16x1xf32, #tpu.memory_space<vmem>>, vector<16x1xf32>
    %42 = vector.shape_cast %38 : vector<16x16xf32> to vector<1x16x16xf32>
    %43 = vector.shape_cast %42 : vector<1x16x16xf32> to vector<1x16x16xf32>
    %44 = vector.broadcast %43 : vector<1x16x16xf32> to vector<8x16x16xf32>
    %cst_23 = arith.constant dense<0.000000e+00> : vector<8x16x128xf32>
    %45 = tpu.matmul %44, %0, %cst_23 {dimension_numbers = #tpu.dot_dimension_numbers<[2], [1], [1], [2], [0, 0, 0, 1, 1, 2], [0], [0]>} : vector<8x16x16xf32>, vector<8x16x128xf32>, vector<8x16x128xf32> -> vector<8x16x128xf32>
    %46 = vector.shape_cast %39 : vector<16x1xf32> to vector<1x16x1xf32>
    %47 = vector.broadcast %46 : vector<1x16x1xf32> to vector<8x16x128xf32>
    %48 = arith.addf %45, %47 : vector<8x16x128xf32>
    %cst_24 = arith.constant dense<0.000000e+00> : vector<8x128xf32>
    %49 = vector.multi_reduction <add>, %48, %cst_24 [1] : vector<8x16x128xf32> to vector<8x128xf32>
    %50 = vector.shape_cast %49 : vector<8x128xf32> to vector<8x1x128xf32>
    %cst_25 = arith.constant 1.600000e+01 : f32
    %51 = vector.broadcast %cst_25 : f32 to vector<8x1x128xf32>
    %52 = arith.divf %50, %51 : vector<8x1x128xf32>
    %53 = vector.broadcast %52 : vector<8x1x128xf32> to vector<8x16x128xf32>
    %54 = arith.subf %48, %53 : vector<8x16x128xf32>
    %55 = vector.broadcast %52 : vector<8x1x128xf32> to vector<8x16x128xf32>
    %56 = arith.subf %48, %55 : vector<8x16x128xf32>
    %57 = arith.mulf %54, %56 : vector<8x16x128xf32>
    %cst_26 = arith.constant dense<0.000000e+00> : vector<8x128xf32>
    %58 = vector.multi_reduction <add>, %57, %cst_26 [1] : vector<8x16x128xf32> to vector<8x128xf32>
    %59 = vector.shape_cast %58 : vector<8x128xf32> to vector<8x1x128xf32>
    %cst_27 = arith.constant 1.600000e+01 : f32
    %60 = vector.broadcast %cst_27 : f32 to vector<8x1x128xf32>
    %61 = arith.divf %59, %60 : vector<8x1x128xf32>
    %62 = vector.broadcast %52 : vector<8x1x128xf32> to vector<8x16x128xf32>
    %63 = arith.subf %48, %62 : vector<8x16x128xf32>
    %cst_28 = arith.constant 9.99999974E-6 : f32
    %64 = vector.broadcast %cst_28 : f32 to vector<8x1x128xf32>
    %65 = arith.addf %61, %64 : vector<8x1x128xf32>
    %66 = math.rsqrt %65 : vector<8x1x128xf32>
    %67 = vector.broadcast %66 : vector<8x1x128xf32> to vector<8x16x128xf32>
    %68 = arith.mulf %63, %67 : vector<8x16x128xf32>
    %69 = vector.shape_cast %40 : vector<16x1xf32> to vector<1x16x1xf32>
    %70 = vector.broadcast %69 : vector<1x16x1xf32> to vector<8x16x128xf32>
    %71 = arith.mulf %68, %70 : vector<8x16x128xf32>
    %72 = vector.shape_cast %41 : vector<16x1xf32> to vector<1x16x1xf32>
    %73 = vector.broadcast %72 : vector<1x16x1xf32> to vector<8x16x128xf32>
    %74 = arith.addf %71, %73 : vector<8x16x128xf32>
    %cst_29 = arith.constant dense<0.000000e+00> : vector<8x16x16xf32>
    %75 = tpu.matmul %37, %74, %cst_29 {dimension_numbers = #tpu.dot_dimension_numbers<[2], [2], [1], [1], [0, 0, 0, 1, 1, 1], [0], [0]>} : vector<8x16x128xf32>, vector<8x16x128xf32>, vector<8x16x16xf32> -> vector<8x16x16xf32>
    %cst_30 = arith.constant dense<0xFF800000> : vector<8x16xf32>
    %76 = vector.multi_reduction <maximumf>, %75, %cst_30 [2] : vector<8x16x16xf32> to vector<8x16xf32>
    %77 = vector.shape_cast %76 : vector<8x16xf32> to vector<8x16x1xf32>
    %78 = vector.broadcast %77 : vector<8x16x1xf32> to vector<8x16x16xf32>
    %79 = arith.subf %75, %78 : vector<8x16x16xf32>
    %80 = math.exp %79 : vector<8x16x16xf32>
    %cst_31 = arith.constant dense<0.000000e+00> : vector<8x16xf32>
    %81 = vector.multi_reduction <add>, %80, %cst_31 [2] : vector<8x16x16xf32> to vector<8x16xf32>
    %82 = vector.shape_cast %81 : vector<8x16xf32> to vector<8x16x1xf32>
    %83 = tpu.reciprocal %82 {approx = true} : vector<8x16x1xf32> -> vector<8x16x1xf32>
    %84 = arith.mulf %82, %83 : vector<8x16x1xf32>
    %cst_32 = arith.constant 2.000000e+00 : f32
    %85 = vector.broadcast %cst_32 : f32 to vector<8x16x1xf32>
    %86 = arith.subf %85, %84 : vector<8x16x1xf32>
    %87 = arith.mulf %83, %86 : vector<8x16x1xf32>
    %88 = vector.broadcast %87 : vector<8x16x1xf32> to vector<8x16x16xf32>
    %89 = arith.mulf %80, %88 : vector<8x16x16xf32>
    %cst_33 = arith.constant dense<0.000000e+00> : vector<8x16xf32>
    %90 = vector.multi_reduction <add>, %89, %cst_33 [2] : vector<8x16x16xf32> to vector<8x16xf32>
    %91 = vector.shape_cast %90 : vector<8x16xf32> to vector<8x16x1xf32>
    %92 = vector.broadcast %91 : vector<8x16x1xf32> to vector<8x16x128xf32>
    %93 = arith.mulf %0, %92 : vector<8x16x128xf32>
    %c0_34 = arith.constant 0 : index
    %c0_35 = arith.constant 0 : index
    %94 = vector.load %arg10[%c0_34, %c0_35] : memref<16x16xf32, #tpu.memory_space<vmem>>, vector<16x16xf32>
    %c0_36 = arith.constant 0 : index
    %c0_37 = arith.constant 0 : index
    %95 = vector.load %arg11[%c0_36, %c0_37] : memref<16x1xf32, #tpu.memory_space<vmem>>, vector<16x1xf32>
    %c0_38 = arith.constant 0 : index
    %c0_39 = arith.constant 0 : index
    %96 = vector.load %arg12[%c0_38, %c0_39] : memref<16x1xf32, #tpu.memory_space<vmem>>, vector<16x1xf32>
    %c0_40 = arith.constant 0 : index
    %c0_41 = arith.constant 0 : index
    %97 = vector.load %arg13[%c0_40, %c0_41] : memref<16x1xf32, #tpu.memory_space<vmem>>, vector<16x1xf32>
    %98 = vector.shape_cast %94 : vector<16x16xf32> to vector<1x16x16xf32>
    %99 = vector.shape_cast %98 : vector<1x16x16xf32> to vector<1x16x16xf32>
    %100 = vector.broadcast %99 : vector<1x16x16xf32> to vector<8x16x16xf32>
    %cst_42 = arith.constant dense<0.000000e+00> : vector<8x16x128xf32>
    %101 = tpu.matmul %100, %93, %cst_42 {dimension_numbers = #tpu.dot_dimension_numbers<[2], [1], [1], [2], [0, 0, 0, 1, 1, 2], [0], [0]>} : vector<8x16x16xf32>, vector<8x16x128xf32>, vector<8x16x128xf32> -> vector<8x16x128xf32>
    %102 = vector.shape_cast %95 : vector<16x1xf32> to vector<1x16x1xf32>
    %103 = vector.broadcast %102 : vector<1x16x1xf32> to vector<8x16x128xf32>
    %104 = arith.addf %101, %103 : vector<8x16x128xf32>
    %cst_43 = arith.constant dense<0.000000e+00> : vector<8x128xf32>
    %105 = vector.multi_reduction <add>, %104, %cst_43 [1] : vector<8x16x128xf32> to vector<8x128xf32>
    %106 = vector.shape_cast %105 : vector<8x128xf32> to vector<8x1x128xf32>
    %cst_44 = arith.constant 1.600000e+01 : f32
    %107 = vector.broadcast %cst_44 : f32 to vector<8x1x128xf32>
    %108 = arith.divf %106, %107 : vector<8x1x128xf32>
    %109 = vector.broadcast %108 : vector<8x1x128xf32> to vector<8x16x128xf32>
    %110 = arith.subf %104, %109 : vector<8x16x128xf32>
    %111 = vector.broadcast %108 : vector<8x1x128xf32> to vector<8x16x128xf32>
    %112 = arith.subf %104, %111 : vector<8x16x128xf32>
    %113 = arith.mulf %110, %112 : vector<8x16x128xf32>
    %cst_45 = arith.constant dense<0.000000e+00> : vector<8x128xf32>
    %114 = vector.multi_reduction <add>, %113, %cst_45 [1] : vector<8x16x128xf32> to vector<8x128xf32>
    %115 = vector.shape_cast %114 : vector<8x128xf32> to vector<8x1x128xf32>
    %cst_46 = arith.constant 1.600000e+01 : f32
    %116 = vector.broadcast %cst_46 : f32 to vector<8x1x128xf32>
    %117 = arith.divf %115, %116 : vector<8x1x128xf32>
    %118 = vector.broadcast %108 : vector<8x1x128xf32> to vector<8x16x128xf32>
    %119 = arith.subf %104, %118 : vector<8x16x128xf32>
    %cst_47 = arith.constant 9.99999974E-6 : f32
    %120 = vector.broadcast %cst_47 : f32 to vector<8x1x128xf32>
    %121 = arith.addf %117, %120 : vector<8x1x128xf32>
    %122 = math.rsqrt %121 : vector<8x1x128xf32>
    %123 = vector.broadcast %122 : vector<8x1x128xf32> to vector<8x16x128xf32>
    %124 = arith.mulf %119, %123 : vector<8x16x128xf32>
    %125 = vector.shape_cast %96 : vector<16x1xf32> to vector<1x16x1xf32>
    %126 = vector.broadcast %125 : vector<1x16x1xf32> to vector<8x16x128xf32>
    %127 = arith.mulf %124, %126 : vector<8x16x128xf32>
    %128 = vector.shape_cast %97 : vector<16x1xf32> to vector<1x16x1xf32>
    %129 = vector.broadcast %128 : vector<1x16x1xf32> to vector<8x16x128xf32>
    %130 = arith.addf %127, %129 : vector<8x16x128xf32>
    %c0_48 = arith.constant 0 : index
    %c0_49 = arith.constant 0 : index
    %c0_50 = arith.constant 0 : index
    %131 = vector.load %arg14[%c0_48, %c0_49, %c0_50] : memref<8x16x128xf32, #tpu.memory_space<vmem>>, vector<8x16x128xf32>
    tpu.vector_store %arg14[%c0_48, %c0_49, %c0_50], %130 {strides = array<i32>} : memref<8x16x128xf32, #tpu.memory_space<vmem>>, vector<8x16x128xf32>,
    return
  }
  func.func @transform_0(%arg0: i32) -> (i32, i32, i32) {
    %c0_i32 = arith.constant 0 : i32
    %c0_i32_0 = arith.constant 0 : i32
    %c0_i32_1 = arith.constant 0 : i32
    return %arg0, %c0_i32, %c0_i32_0 : i32, i32, i32
  }
  func.func @transform_1(%arg0: i32) -> (i32, i32) {
    %c0_i32 = arith.constant 0 : i32
    %c0_i32_0 = arith.constant 0 : i32
    %c0_i32_1 = arith.constant 0 : i32
    return %c0_i32, %c0_i32_0 : i32, i32
  }
  func.func @transform_2(%arg0: i32) -> (i32, i32) {
    %c0_i32 = arith.constant 0 : i32
    %c0_i32_0 = arith.constant 0 : i32
    %c0_i32_1 = arith.constant 0 : i32
    return %c0_i32, %c0_i32_0 : i32, i32
  }
  func.func @transform_3(%arg0: i32) -> (i32, i32) {
    %c0_i32 = arith.constant 0 : i32
    %c0_i32_0 = arith.constant 0 : i32
    %c0_i32_1 = arith.constant 0 : i32
    return %c0_i32, %c0_i32_0 : i32, i32
  }
  func.func @transform_4(%arg0: i32) -> (i32, i32) {
    %c0_i32 = arith.constant 0 : i32
    %c0_i32_0 = arith.constant 0 : i32
    %c0_i32_1 = arith.constant 0 : i32
    return %c0_i32, %c0_i32_0 : i32, i32
  }
  func.func @transform_5(%arg0: i32) -> (i32, i32) {
    %c0_i32 = arith.constant 0 : i32
    %c0_i32_0 = arith.constant 0 : i32
    %c0_i32_1 = arith.constant 0 : i32
    return %c0_i32, %c0_i32_0 : i32, i32
  }
  func.func @transform_6(%arg0: i32) -> (i32, i32) {
    %c0_i32 = arith.constant 0 : i32
    %c0_i32_0 = arith.constant 0 : i32
    %c0_i32_1 = arith.constant 0 : i32
    return %c0_i32, %c0_i32_0 : i32, i32
  }
  func.func @transform_7(%arg0: i32) -> (i32, i32) {
    %c0_i32 = arith.constant 0 : i32
    %c0_i32_0 = arith.constant 0 : i32
    %c0_i32_1 = arith.constant 0 : i32
    return %c0_i32, %c0_i32_0 : i32, i32
  }
  func.func @transform_8(%arg0: i32) -> (i32, i32) {
    %c0_i32 = arith.constant 0 : i32
    %c0_i32_0 = arith.constant 0 : i32
    %c0_i32_1 = arith.constant 0 : i32
    return %c0_i32, %c0_i32_0 : i32, i32
  }
  func.func @transform_9(%arg0: i32) -> (i32, i32) {
    %c0_i32 = arith.constant 0 : i32
    %c0_i32_0 = arith.constant 0 : i32
    %c0_i32_1 = arith.constant 0 : i32
    return %c0_i32, %c0_i32_0 : i32, i32
  }
  func.func @transform_10(%arg0: i32) -> (i32, i32) {
    %c0_i32 = arith.constant 0 : i32
    %c0_i32_0 = arith.constant 0 : i32
    %c0_i32_1 = arith.constant 0 : i32
    return %c0_i32, %c0_i32_0 : i32, i32
  }
  func.func @transform_11(%arg0: i32) -> (i32, i32) {
    %c0_i32 = arith.constant 0 : i32
    %c0_i32_0 = arith.constant 0 : i32
    %c0_i32_1 = arith.constant 0 : i32
    return %c0_i32, %c0_i32_0 : i32, i32
  }
  func.func @transform_12(%arg0: i32) -> (i32, i32) {
    %c0_i32 = arith.constant 0 : i32
    %c0_i32_0 = arith.constant 0 : i32
    %c0_i32_1 = arith.constant 0 : i32
    return %c0_i32, %c0_i32_0 : i32, i32
  }
  func.func @transform_13(%arg0: i32) -> (i32, i32, i32) {
    %c0_i32 = arith.constant 0 : i32
    %c0_i32_0 = arith.constant 0 : i32
    %c0_i32_1 = arith.constant 0 : i32
    return %arg0, %c0_i32, %c0_i32_0 : i32, i32, i32
  }
}

</mosaic_0001>

<bundles_post_ra>
// kernel: tpu_custom_call.1
= control target key start
LH: loop header
LB: loop body
LE: loop exit
PB: predicated region body
PF: predicated region fallthrough
CT: control target
= control target key end

     0   :  { %18 = vsyncpa [#allocation3], 0  ;;  %s3626_s0 = inlined_call_operand.hbm [shape: f32[8,16,128], index: 0, kind: input, shape index: {}]   ;;  %s3627_s1 = inlined_call_operand.vmem [shape: f32[16,16], index: 1, kind: input, shape index: {}]   ;;  %s3628_s2 = inlined_call_operand.vmem [shape: f32[16,1], index: 2, kind: input, shape index: {}]   ;;  %s3629_s3 = inlined_call_operand.vmem [shape: f32[16,1], index: 3, kind: input, shape index: {}]   ;;  %s3630_s4 = inlined_call_operand.vmem [shape: f32[16,1], index: 4, kind: input, shape index: {}]   ;;  %s3631_s5 = inlined_call_operand.vmem [shape: f32[16,16], index: 5, kind: input, shape index: {}]   ;;  %s3632_s6 = inlined_call_operand.vmem [shape: f32[16,1], index: 6, kind: input, shape index: {}]   ;;  %s3633_s7 = inlined_call_operand.vmem [shape: f32[16,1], index: 7, kind: input, shape index: {}]   ;;  %s3634_s8 = inlined_call_operand.vmem [shape: f32[16,1], index: 8, kind: input, shape index: {}]   ;;  %s3635_s9 = inlined_call_operand.vmem [shape: f32[16,16], index: 9, kind: input, shape index: {}]   ;;  %s3636_s10 = inlined_call_operand.vmem [shape: f32[16,1], index: 10, kind: input, shape index: {}]   ;;  %s3637_s11 = inlined_call_operand.vmem [shape: f32[16,1], index: 11, kind: input, shape index: {}]   ;;  %s3638_s12 = inlined_call_operand.vmem [shape: f32[16,1], index: 12, kind: input, shape index: {}]   ;;  %s3639_s13 = inlined_call_operand.hbm [shape: f32[8,16,128], index: 13, kind: output, shape index: {}]  }
   0x1   :  { %19 = vsyncpa [#allocation4], 0  ;;  %s24_s27 = sshll.u32 %s3626_s0, 4  ;;  %s2403_s28 = smov [#allocation2]   ;;  %s25_s27 = int_to_ptr.hbm [resolvable:$true] %s24_s27 }
   0x2   :  { %s26_s29 = sshll.u32 %s2403_s28, 4  ;;  %s2404_s30 = smov 128   ;;  %s27_s29 = int_to_ptr.vmem [resolvable:$true] %s26_s29 }
   0x3   :  { %s2405_s14 = smov 8  }
   0x4   :  { %32 = dma.hbm_to_vmem [thread:$0]  %s25_s27, 2048, %s27_s29, [#allocation3], %s2404_s30, %s2404_s30, %s2405_s14  }
   0x5   :  { %2399 = dma.done.wait [#allocation3], 2048  }
   0x6   :  { %2400 = vsyncadd [#allocation3], 4294965248  ;;  %v2406_v0 = vmov 0   ;;  %v62_v1 = vld [vmem:[#allocation2 + $0x8] sm:$0xff]  ;;  %v64_v2 = vld [vmem:[#allocation2 + $0x18] sm:$0xff]  ;;  %vm95_vm0 = vcmask 130048  }
   0x7   :  { %2219 = vset.pattern.permute.xlu1 %v2406_v0  ;;  %2218 = vset.pattern.permute.xlu0 %v2406_v0  ;;  %v66_v3 = vld [vmem:[#allocation2 + $0x28] sm:$0xff]  ;;  %v68_v4 = vld [vmem:[#allocation2 + $0x38] sm:$0xff]  ;;  %v61_v5 = vld [vmem:[#allocation2] sm:$0xff]  ;;  %v2407_v34 = vmov 16.0   ;;  %s2151_s19 = sshll.u32 %s3639_s13, 4  ;;  %s2152_s19 = int_to_ptr.hbm [resolvable:$true] %s2151_s19 }
   0x8   :  { %2220 = vset.pattern.permute.xlu2 %v2406_v0  ;;  %116 = vmatpush.msra.mxu0 %v62_v1  ;;  %v63_v6 = vld [vmem:[#allocation2 + $0x10] sm:$0xff]  ;;  %v65_v7 = vld [vmem:[#allocation2 + $0x20] sm:$0xff]  ;;  %v70_v11 = vld [vmem:[#allocation2 + $0x48] sm:$0xff]  ;;  %2221 = vrcp.f32 %v2407_v34 }
   0x9   :  { %139 = vmatpush.msra.mxu1 %v64_v2  ;;  %162 = vmatpush.msra.mxu2 %v66_v3  ;;  %v67_v8 = vld [vmem:[#allocation2 + $0x30] sm:$0xff]  ;;  %v77_v9 = vld [vmem:[%s3627_s1] sm:$0xff]  ;;  %v72_v12 = vld [vmem:[#allocation2 + $0x58] sm:$0xff] }
   0xa   :  { %185 = vmatpush.msra.mxu3 %v68_v4  ;;  %117 = vmatpush.msra.mxu0 %v61_v5  ;;  %v79_v10 = vld [vmem:[%s3628_s2] sm:$0xff]  ;;  %v74_v13 = vld [vmem:[#allocation2 + $0x68] sm:$0xff]  ;;  %v76_v14 = vld [vmem:[#allocation2 + $0x78] sm:$0xff] }
   0xb   :  { %140 = vmatpush.msra.mxu1 %v63_v6  ;;  %163 = vmatpush.msra.mxu2 %v65_v7  ;;  %v69_v15 = vld [vmem:[#allocation2 + $0x40] sm:$0xff]  ;;  %v71_v16 = vld [vmem:[#allocation2 + $0x50] sm:$0xff]  ;;  %v78_v20 = vld [vmem:[%s3627_s1 + $0x8] sm:$0xff] }
   0xc   :  { %186 = vmatpush.msra.mxu3 %v67_v8  ;;  %2164 = vmatmul.msk.f32.vlgmr.msra.gmra.mxu0 %vm95_vm0, %v77_v9  ;;  %v73_v17 = vld [vmem:[#allocation2 + $0x60] sm:$0xff]  ;;  %v75_v18 = vld [vmem:[#allocation2 + $0x70] sm:$0xff]  ;;  %v80_v21 = vld [vmem:[%s3628_s2 + $0x8] sm:$0xff] }
   0xd   :  { %2166 = vmatmul.msk.f32.vlgmr.msra.gmra.mxu1 %vm95_vm0, %v77_v9  ;;  %2168 = vmatmul.msk.f32.vlgmr.msra.gmra.mxu2 %vm95_vm0, %v77_v9  ;;  %v611_v19 = vld [vmem:[%s3632_s6] sm:$0xff]  ;;  %v612_v22 = vld [vmem:[%s3632_s6 + $0x8] sm:$0xff] }
   0xe   :  { %2170 = vmatmul.msk.f32.vlgmr.msra.gmra.mxu3 %vm95_vm0, %v77_v9  ;;  %87 = vperm.xlu1 %2219, %v79_v10   ;;  %v615_v23 = vld [vmem:[%s3634_s8] sm:$0xff]  ;;  %v82_v25 = vld [vmem:[%s3629_s3 + $0x8] sm:$0xff]  ;;  %v2222_v37 = vpop.eup %2221 }
   0xf   :  { %208 = vmatpush.msrb.mxu0 %v70_v11  ;;  %231 = vmatpush.msrb.mxu1 %v72_v12  ;;  %v613_v24 = vld [vmem:[%s3633_s7] sm:$0xff]  ;;  %v614_v26 = vld [vmem:[%s3633_s7 + $0x8] sm:$0xff]  ;;  %v343_v39 = vmul.f32 16.0, %v2222_v37  ;;  %vm347_vm1 = vweird.f32 %v2222_v37 }
  0x10   :  { %254 = vmatpush.msrb.mxu2 %v74_v13  ;;  %277 = vmatpush.msrb.mxu3 %v76_v14  ;;  %v83_v27 = vld [vmem:[%s3630_s4] sm:$0xff]  ;;  %v616_v29 = vld [vmem:[%s3634_s8 + $0x8] sm:$0xff] }
  0x11   :  { %209 = vmatpush.msrb.mxu0 %v69_v15  ;;  %232 = vmatpush.msrb.mxu1 %v71_v16  ;;  %v609_v28 = vld [vmem:[%s3631_s5] sm:$0xff]  ;;  %v610_v30 = vld [vmem:[%s3631_s5 + $0x8] sm:$0xff]  ;;  %v344_v48 = vsub.f32 1.0, %v343_v39 }
  0x12   :  { %255 = vmatpush.msrb.mxu2 %v73_v17  ;;  %278 = vmatpush.msrb.mxu3 %v75_v18  ;;  %v81_v31 = vld [vmem:[%s3629_s3] sm:$0xff]  ;;  %v84_v32 = vld [vmem:[%s3630_s4 + $0x8] sm:$0xff] }
  0x13   :  { %619 = vperm.xlu0 %2218, %v611_v19   ;;  %647 = vmatpush.msra.mxu0 %v62_v1  ;;  %v345_v53 = vmul.f32 %v2222_v37, %v344_v48 }
  0x14   :  { %670 = vmatpush.msra.mxu1 %v64_v2  ;;  %2165 = vmatmul.msk.f32.gmra.mxu0 %vm95_vm0, %v78_v20 }
  0x15   :  { %2167 = vmatmul.msk.f32.gmra.mxu1 %vm95_vm0, %v78_v20  ;;  %2169 = vmatmul.msk.f32.gmra.mxu2 %vm95_vm0, %v78_v20  ;;  %v346_v2 = vadd.f32 %v2222_v37, %v345_v53 }
  0x16   :  { %2171 = vmatmul.msk.f32.gmra.mxu3 %vm95_vm0, %v78_v20  ;;  %92 = vperm.xlu1 %2219, %v80_v21  }
  0x17   :  { %693 = vmatpush.msra.mxu2 %v66_v3  ;;  %716 = vmatpush.msra.mxu3 %v68_v4 }
  0x18   :  { %648 = vmatpush.msra.mxu0 %v61_v5  ;;  %671 = vmatpush.msra.mxu1 %v63_v6 }
  0x19   :  { %694 = vmatpush.msra.mxu2 %v65_v7  ;;  %717 = vmatpush.msra.mxu3 %v67_v8 }
  0x1a   :  { %1088 = vperm.xlu2 %2220, %v614_v26  }
  0x1b   :  { %624 = vperm.xlu0 %2218, %v612_v22  }
  0x1c   :  { %2172 = vmatmul.msk.f32.vlgmr.msrb.gmra.mxu0 %vm95_vm0, %v77_v9 }
  0x1d   :  { %2174 = vmatmul.msk.f32.vlgmr.msrb.gmra.mxu1 %vm95_vm0, %v77_v9  ;;  %2176 = vmatmul.msk.f32.vlgmr.msrb.gmra.mxu2 %vm95_vm0, %v77_v9 }
  0x1e   :  { %2178 = vmatmul.msk.f32.vlgmr.msrb.gmra.mxu3 %vm95_vm0, %v77_v9  ;;  %739 = vmatpush.msrb.mxu0 %v70_v11  ;;  %v2589_v11 = vsel %vm347_vm1, %v2222_v37, %v346_v2 }
  0x1f   :  { %762 = vmatpush.msrb.mxu1 %v72_v12  ;;  %785 = vmatpush.msrb.mxu2 %v74_v13 }
  0x20   :  { %808 = vmatpush.msrb.mxu3 %v76_v14  ;;  %1109 = vperm.xlu1 %2219, %v615_v23  }
  0x21   :  { %740 = vmatpush.msrb.mxu0 %v69_v15  ;;  %763 = vmatpush.msrb.mxu1 %v71_v16 }
  0x22   :  { %786 = vmatpush.msrb.mxu2 %v73_v17  ;;  %809 = vmatpush.msrb.mxu3 %v75_v18 }
  0x23   :  { %1083 = vperm.xlu0 %2218, %v613_v24   ;;  %1114 = vperm.xlu2 %2220, %v616_v29  }
  0x24   :  { %2173 = vmatmul.msk.f32.gmra.mxu0 %vm95_vm0, %v78_v20 }
  0x25   :  { %2175 = vmatmul.msk.f32.gmra.mxu1 %vm95_vm0, %v78_v20  ;;  %2177 = vmatmul.msk.f32.gmra.mxu2 %vm95_vm0, %v78_v20 }
  0x26   :  { %2179 = vmatmul.msk.f32.gmra.mxu3 %vm95_vm0, %v78_v20 }
  0x28   :  { %564 = vperm.xlu1 %2219, %v82_v25  }
  0x2b   :  { %585 = vperm.xlu0 %2218, %v83_v27   ;;  %559 = vperm.xlu2 %2220, %v81_v31  }
  0x2c   :  { %2180 = vmatmul.msk.f32.vlgmr.msra.gmra.mxu0 %vm95_vm0, %v609_v28 }
  0x2d   :  { %2182 = vmatmul.msk.f32.vlgmr.msra.gmra.mxu1 %vm95_vm0, %v609_v28  ;;  %2184 = vmatmul.msk.f32.vlgmr.msra.gmra.mxu2 %vm95_vm0, %v609_v28 }
  0x2e   :  { %2186 = vmatmul.msk.f32.vlgmr.msra.gmra.mxu3 %vm95_vm0, %v609_v28 }
  0x33   :  { %590 = vperm.xlu2 %2220, %v84_v32  }
  0x34   :  { %2181 = vmatmul.msk.f32.gmra.mxu0 %vm95_vm0, %v610_v30 }
  0x35   :  { %2183 = vmatmul.msk.f32.gmra.mxu1 %vm95_vm0, %v610_v30  ;;  %2185 = vmatmul.msk.f32.gmra.mxu2 %vm95_vm0, %v610_v30 }
  0x36   :  { %2187 = vmatmul.msk.f32.gmra.mxu3 %vm95_vm0, %v610_v30 }
  0x3c   :  { %2188 = vmatmul.msk.f32.vlgmr.msrb.gmra.mxu0 %vm95_vm0, %v609_v28 }
  0x3d   :  { %2190 = vmatmul.msk.f32.vlgmr.msrb.gmra.mxu1 %vm95_vm0, %v609_v28  ;;  %2192 = vmatmul.msk.f32.vlgmr.msrb.gmra.mxu2 %vm95_vm0, %v609_v28 }
  0x3e   :  { %2194 = vmatmul.msk.f32.vlgmr.msrb.gmra.mxu3 %vm95_vm0, %v609_v28 }
  0x44   :  { %2189 = vmatmul.msk.f32.gmra.mxu0 %vm95_vm0, %v610_v30 }
  0x45   :  { %2191 = vmatmul.msk.f32.gmra.mxu1 %vm95_vm0, %v610_v30  ;;  %2193 = vmatmul.msk.f32.gmra.mxu2 %vm95_vm0, %v610_v30 }
  0x46   :  { %2195 = vmatmul.msk.f32.gmra.mxu3 %vm95_vm0, %v610_v30 }
  0x80   :  { %v2565_v33 = vpop.permute.xlu1 %87 }
  0x88   :  { %v2567_v38 = vpop.permute.xlu1 %92 }
  0x89   :  { %v119_v35 = vpop.f32.mrf.mxu0 }
  0x8a   :  { %v142_v36 = vpop.f32.mrf.mxu1  ;;  %v120_v45 = vadd.f32 %v119_v35, %v2565_v33 }
  0x8b   :  { %v143_v40 = vadd.f32 %v142_v36, %v2565_v33 }
  0x90   :  { %v165_v41 = vpop.f32.mrf.mxu2 }
  0x91   :  { %v188_v42 = vpop.f32.mrf.mxu3  ;;  %v122_v43 = vpop.f32.mrf.mxu0  ;;  %v2574_v58 = vadd.f32 %v165_v41, %v2565_v33 }
  0x92   :  { %v145_v44 = vpop.f32.mrf.mxu1  ;;  %v123_v46 = vadd.f32 %v122_v43, %v2567_v38  ;;  %v2577_v59 = vadd.f32 %v188_v42, %v2565_v33 }
  0x93   :  { %v146_v47 = vadd.f32 %v145_v44, %v2567_v38 }
  0x94   :  { %v286_v49 = vadd.f32 %v123_v46, %v120_v45 }
  0x95   :  { %v293_v50 = vadd.f32 %v146_v47, %v143_v40 }
  0x96   :  { %v287_v51 = vrot.slane %v286_v49, 4 }
  0x97   :  { %v294_v52 = vrot.slane %v293_v50, 4 }
  0x98   :  { %v288_v54 = vadd.f32 %v287_v51, %v286_v49  ;;  %v168_v56 = vpop.f32.mrf.mxu2 }
  0x99   :  { %v295_v55 = vadd.f32 %v294_v52, %v293_v50  ;;  %v191_v57 = vpop.f32.mrf.mxu3  ;;  %v2580_v60 = vadd.f32 %v168_v56, %v2567_v38  ;;  %v211_v62 = vpop.f32.mrf.mxu0 }
  0x9a   :  { %v2583_v61 = vadd.f32 %v191_v57, %v2567_v38  ;;  %v234_v63 = vpop.f32.mrf.mxu1  ;;  %v289_v0 = vrot.slane %v288_v54, 2  ;;  %v2603_v29 = vadd.f32 %v211_v62, %v2565_v33 }
  0x9b   :  { %v296_v1 = vrot.slane %v295_v55, 2  ;;  %v300_v3 = vadd.f32 %v2580_v60, %v2574_v58  ;;  %v2592_v19 = vadd.f32 %v234_v63, %v2565_v33 }
  0x9c   :  { %v307_v4 = vadd.f32 %v2583_v61, %v2577_v59  ;;  %v290_v5 = vadd.f32 %v289_v0, %v288_v54 }
  0x9d   :  { %v297_v6 = vadd.f32 %v296_v1, %v295_v55  ;;  %v301_v7 = vrot.slane %v300_v3, 4 }
  0x9e   :  { %v308_v8 = vrot.slane %v307_v4, 4  ;;  %v291_v9 = vrot.slane %v290_v5, 1 }
  0x9f   :  { %v298_v10 = vrot.slane %v297_v6, 1  ;;  %v302_v12 = vadd.f32 %v301_v7, %v300_v3 }
  0xa0   :  { %v309_v13 = vadd.f32 %v308_v8, %v307_v4  ;;  %v292_v14 = vadd.f32 %v291_v9, %v290_v5  ;;  %v257_v16 = vpop.f32.mrf.mxu2 }
  0xa1   :  { %v299_v15 = vadd.f32 %v298_v10, %v297_v6  ;;  %v303_v17 = vrot.slane %v302_v12, 2  ;;  %v214_v20 = vpop.f32.mrf.mxu0  ;;  %v280_v24 = vpop.f32.mrf.mxu3  ;;  %v2628_v57 = vadd.f32 %v257_v16, %v2565_v33 }
  0xa2   :  { %v310_v18 = vrot.slane %v309_v13, 2  ;;  %v237_v21 = vpop.f32.mrf.mxu1  ;;  %v349_v22 = vmul.f32 %v2589_v11, %v292_v14  ;;  %v2597_v25 = vadd.f32 %v214_v20, %v2567_v38 }
  0xa3   :  { %v350_v23 = vmul.f32 %v2589_v11, %v299_v15  ;;  %v2600_v26 = vadd.f32 %v237_v21, %v2567_v38  ;;  %v304_v27 = vadd.f32 %v303_v17, %v302_v12 }
  0xa4   :  { %v311_v28 = vadd.f32 %v310_v18, %v309_v13  ;;  %v2605_v30 = vsub.f32 %v120_v45, %v349_v22  ;;  %v2607_v31 = vsub.f32 %v123_v46, %v349_v22  ;;  %v314_v37 = vadd.f32 %v2597_v25, %v2603_v29 }
  0xa5   :  { %v2609_v32 = vsub.f32 %v143_v40, %v350_v23  ;;  %v2611_v34 = vsub.f32 %v146_v47, %v350_v23  ;;  %v305_v35 = vrot.slane %v304_v27, 1  ;;  %v321_v39 = vadd.f32 %v2600_v26, %v2592_v19 }
  0xa6   :  { %v312_v36 = vrot.slane %v311_v28, 1  ;;  %v373_v41 = vmul.f32 %v2605_v30, %v2605_v30  ;;  %v374_v42 = vmul.f32 %v2607_v31, %v2607_v31  ;;  %v315_v46 = vrot.slane %v314_v37, 4 }
  0xa7   :  { %v375_v40 = vmul.f32 %v2609_v32, %v2609_v32  ;;  %v376_v43 = vmul.f32 %v2611_v34, %v2611_v34  ;;  %v306_v44 = vadd.f32 %v305_v35, %v304_v27  ;;  %v322_v47 = vrot.slane %v321_v39, 4 }
  0xa8   :  { %v313_v45 = vadd.f32 %v312_v36, %v311_v28  ;;  %v389_v48 = vadd.f32 %v374_v42, %v373_v41  ;;  %v260_v50 = vpop.f32.mrf.mxu2  ;;  %v316_v53 = vadd.f32 %v315_v46, %v314_v37  ;;  %v2659_v27 = vadd.f32 %v280_v24, %v2565_v33 }
  0xa9   :  { %v396_v49 = vadd.f32 %v376_v43, %v375_v40  ;;  %v351_v51 = vmul.f32 %v2589_v11, %v306_v44  ;;  %v323_v54 = vadd.f32 %v322_v47, %v321_v39  ;;  %v2631_v62 = vadd.f32 %v260_v50, %v2567_v38  ;;  %v283_v7 = vpop.f32.mrf.mxu3 }
  0xaa   :  { %v352_v52 = vmul.f32 %v2589_v11, %v313_v45  ;;  %v390_v55 = vrot.slane %v389_v48, 4  ;;  %v317_v5 = vrot.slane %v316_v53, 2  ;;  %v2656_v16 = vadd.f32 %v283_v7, %v2567_v38 }
  0xab   :  { %v397_v56 = vrot.slane %v396_v49, 4  ;;  %v2634_v63 = vsub.f32 %v2574_v58, %v351_v51  ;;  %v2637_v0 = vsub.f32 %v2580_v60, %v351_v51  ;;  %v324_v6 = vrot.slane %v323_v54, 2 }
  0xac   :  { %v2640_v1 = vsub.f32 %v2577_v59, %v352_v52  ;;  %v2643_v2 = vsub.f32 %v2583_v61, %v352_v52  ;;  %v391_v3 = vadd.f32 %v390_v55, %v389_v48  ;;  %v318_v10 = vadd.f32 %v317_v5, %v316_v53 }
  0xad   :  { %v398_v4 = vadd.f32 %v397_v56, %v396_v49  ;;  %v377_v8 = vmul.f32 %v2634_v63, %v2634_v63  ;;  %v378_v58 = vmul.f32 %v2637_v0, %v2637_v0  ;;  %v325_v12 = vadd.f32 %v324_v6, %v323_v54  ;;  %v650_v6 = vpop.f32.mrf.mxu0 }
  0xae   :  { %v379_v60 = vmul.f32 %v2640_v1, %v2640_v1  ;;  %v380_v59 = vmul.f32 %v2643_v2, %v2643_v2  ;;  %v392_v9 = vrot.slane %v391_v3, 2  ;;  %v328_v15 = vadd.f32 %v2631_v62, %v2628_v57 }
  0xaf   :  { %v399_v61 = vrot.slane %v398_v4, 2  ;;  %v403_v13 = vadd.f32 %v378_v58, %v377_v8  ;;  %v319_v20 = vrot.slane %v318_v10, 1  ;;  %v326_v21 = vrot.slane %v325_v12, 1 }
  0xb0   :  { %v410_v14 = vadd.f32 %v380_v59, %v379_v60  ;;  %v393_v17 = vadd.f32 %v392_v9, %v391_v3  ;;  %v329_v28 = vrot.slane %v328_v15, 4  ;;  %v335_v38 = vadd.f32 %v2656_v16, %v2659_v27 }
  0xb1   :  { %v400_v18 = vadd.f32 %v399_v61, %v398_v4  ;;  %v404_v22 = vrot.slane %v403_v13, 4  ;;  %v320_v37 = vadd.f32 %v319_v20, %v318_v10  ;;  %v327_v39 = vadd.f32 %v326_v21, %v325_v12 }
  0xb2   :  { %v411_v23 = vrot.slane %v410_v14, 4  ;;  %v394_v35 = vrot.slane %v393_v17, 1  ;;  %v330_v40 = vadd.f32 %v329_v28, %v328_v15  ;;  %v336_v52 = vrot.slane %v335_v38, 4 }
  0xb3   :  { %v401_v36 = vrot.slane %v400_v18, 1  ;;  %v405_v41 = vadd.f32 %v404_v22, %v403_v13  ;;  %v353_v45 = vmul.f32 %v2589_v11, %v320_v37  ;;  %v354_v46 = vmul.f32 %v2589_v11, %v327_v39  ;;  %v673_v13 = vpop.f32.mrf.mxu1  ;;  %v696_v37 = vpop.f32.mrf.mxu2 }
  0xb4   :  { %v412_v42 = vadd.f32 %v411_v23, %v410_v14  ;;  %v395_v43 = vadd.f32 %v394_v35, %v393_v17  ;;  %v331_v56 = vrot.slane %v330_v40, 2  ;;  %v337_v8 = vadd.f32 %v336_v52, %v335_v38 }
  0xb5   :  { %v402_v44 = vadd.f32 %v401_v36, %v400_v18  ;;  %v406_v47 = vrot.slane %v405_v41, 2  ;;  %v2667_v48 = vsub.f32 %v2603_v29, %v353_v45  ;;  %v2670_v49 = vsub.f32 %v2597_v25, %v353_v45  ;;  %v653_v35 = vpop.f32.mrf.mxu0 }
  0xb6   :  { %v413_v33 = vrot.slane %v412_v42, 2  ;;  %v445_v24 = vmul.f32 %v395_v43, %v2589_v11  ;;  %v2674_v54 = vsub.f32 %v2592_v19, %v354_v46  ;;  %v2677_v55 = vsub.f32 %v2600_v26, %v354_v46  ;;  %v2687_v19 = vpop.permute.xlu0 %619 }
  0xb7   :  { %3652 = vst [vmem:[#allocation8_spill] sm:$0xff] %v2667_v48  ;;  %v407_v50 = vadd.f32 %v406_v47, %v405_v41  ;;  %v446_v53 = vmul.f32 %v402_v44, %v2589_v11  ;;  %v381_v25 = vmul.f32 %v2667_v48, %v2667_v48  ;;  %v382_v5 = vmul.f32 %v2670_v49, %v2670_v49 }
  0xb8   :  { %3653 = vst [vmem:[#allocation9_spill] sm:$0xff] %v2670_v49  ;;  %v414_v51 = vadd.f32 %v413_v33, %v412_v42  ;;  %v2679_v3 = vadd.f32 1e-05, %v445_v24  ;;  %v383_v26 = vmul.f32 %v2674_v54, %v2674_v54  ;;  %v384_v60 = vmul.f32 %v2677_v55, %v2677_v55 }
  0xb9   :  { %3654 = vst [vmem:[#allocation10_spill] sm:$0xff] %v2674_v54  ;;  %v408_v4 = vrot.slane %v407_v50, 1  ;;  %v2685_v58 = vadd.f32 1e-05, %v446_v53  ;;  %v332_v59 = vadd.f32 %v331_v56, %v330_v40  ;;  %v417_v10 = vadd.f32 %v382_v5, %v381_v25 }
  0xba   :  { %3655 = vst [vmem:[#allocation11_spill] sm:$0xff] %v2677_v55  ;;  %v415_v29 = vrot.slane %v414_v51, 1  ;;  %2223 = vrsqrt.f32 %v2679_v3  ;;  %v424_v14 = vadd.f32 %v384_v60, %v383_v26  ;;  %v338_v15 = vrot.slane %v337_v8, 2 }
  0xbb   :  { %v409_v7 = vadd.f32 %v408_v4, %v407_v50  ;;  %v333_v12 = vrot.slane %v332_v59, 1  ;;  %2225 = vrsqrt.f32 %v2685_v58  ;;  %v418_v21 = vrot.slane %v417_v10, 4  ;;  %v676_v46 = vpop.f32.mrf.mxu1 }
  0xbc   :  { %v416_v61 = vadd.f32 %v415_v29, %v414_v51  ;;  %v425_v23 = vrot.slane %v424_v14, 4  ;;  %v339_v28 = vadd.f32 %v338_v15, %v337_v8  ;;  %v2723_v50 = vadd.f32 %v650_v6, %v2687_v19  ;;  %v719_v51 = vpop.f32.mrf.mxu3 }
  0xbd   :  { %v447_v9 = vmul.f32 %v409_v7, %v2589_v11  ;;  %v334_v17 = vadd.f32 %v333_v12, %v332_v59  ;;  %v419_v38 = vadd.f32 %v418_v21, %v417_v10  ;;  %v2740_v7 = vadd.f32 %v673_v13, %v2687_v19 }
  0xbe   :  { %v448_v20 = vmul.f32 %v416_v61, %v2589_v11  ;;  %v2709_v40 = vpop.permute.xlu0 %624  ;;  %v426_v44 = vadd.f32 %v425_v23, %v424_v14  ;;  %v340_v45 = vrot.slane %v339_v28, 1  ;;  %v699_v61 = vpop.f32.mrf.mxu2  ;;  %vm467_vm2 = vweird.f32 %v2679_v3 }
  0xbf   :  { %v2696_v18 = vadd.f32 1e-05, %v447_v9  ;;  %v355_v36 = vmul.f32 %v2589_v11, %v334_v17  ;;  %v2712_v43 = vadd.f32 %v653_v35, %v2709_v40  ;;  %v420_v53 = vrot.slane %v419_v38, 2 }
  0xc0   :  { %v2699_v22 = vpop.eup %2223  ;;  %v2707_v42 = vadd.f32 1e-05, %v448_v20  ;;  %v2730_v4 = vadd.f32 %v676_v46, %v2709_v40  ;;  %v427_v29 = vrot.slane %v426_v44, 2  ;;  %vm477_vm3 = vweird.f32 %v2685_v58 }
  0xc1   :  { %v2702_v39 = vpop.eup %2225  ;;  %v462_v41 = vmul.f32 %v2699_v22, %v2679_v3  ;;  %2227 = vrsqrt.f32 %v2696_v18  ;;  %v2717_v33 = vsub.f32 %v2628_v57, %v355_v36  ;;  %v2720_v24 = vsub.f32 %v2631_v62, %v355_v36 }
  0xc2   :  { %v472_v47 = vmul.f32 %v2702_v39, %v2685_v58  ;;  %2229 = vrsqrt.f32 %v2707_v42  ;;  %v817_v56 = vadd.f32 %v2712_v43, %v2723_v50  ;;  %v341_v62 = vadd.f32 %v340_v45, %v339_v28 }
  0xc3   :  { %3656 = vst [vmem:[#allocation12_spill] sm:$0xff] %v2717_v33  ;;  %v463_v52 = vmul.f32 %v2699_v22, %v462_v41  ;;  %v385_v5 = vmul.f32 %v2717_v33, %v2717_v33  ;;  %v386_v6 = vmul.f32 %v2720_v24, %v2720_v24  ;;  %v421_v26 = vadd.f32 %v420_v53, %v419_v38 }
  0xc4   :  { %3657 = vst [vmem:[#allocation13_spill] sm:$0xff] %v2720_v24  ;;  %v473_v25 = vmul.f32 %v2702_v39, %v472_v47  ;;  %v818_v59 = vrot.slane %v817_v56, 4  ;;  %v824_v9 = vadd.f32 %v2730_v4, %v2740_v7  ;;  %v428_v12 = vadd.f32 %v427_v29, %v426_v44  ;;  %v722_v44 = vpop.f32.mrf.mxu3 }
  0xc5   :  { %v464_v8 = vmul.f32 0.5, %v463_v52  ;;  %v356_v14 = vmul.f32 %v2589_v11, %v341_v62  ;;  %v431_v17 = vadd.f32 %v386_v6, %v385_v5  ;;  %v422_v23 = vrot.slane %v421_v26, 1 }
  0xc6   :  { %v474_v15 = vmul.f32 0.5, %v473_v25  ;;  %v819_v20 = vadd.f32 %v818_v59, %v817_v56  ;;  %v825_v13 = vrot.slane %v824_v9, 4  ;;  %v2751_v28 = vadd.f32 %v699_v61, %v2709_v40 }
  0xc7   :  { %v2732_v57 = vpop.eup %2227  ;;  %v465_v21 = vsub.f32 1.5, %v464_v8  ;;  %v2758_v41 = vadd.f32 %v696_v37, %v2687_v19  ;;  %v2761_v38 = vadd.f32 %v719_v51, %v2687_v19  ;;  %vm468_vm4 = vweird.f32 %v2699_v22 }
  0xc8   :  { %v482_v60 = vmul.f32 %v2732_v57, %v2696_v18  ;;  %v2746_v10 = vpop.eup %2229  ;;  %v429_v45 = vrot.slane %v428_v12, 1  ;;  %v2765_v46 = vsub.f32 %v2659_v27, %v356_v14  ;;  %v2768_v47 = vsub.f32 %v2656_v16, %v356_v14  ;;  %vm469_vm6 = vmor %vm467_vm2, %vm468_vm4 }
  0xc9   :  { %v492_v36 = vmul.f32 %v2746_v10, %v2707_v42  ;;  %v475_v52 = vsub.f32 1.5, %v474_v15  ;;  %v432_v53 = vrot.slane %v431_v17, 4  ;;  %v820_v56 = vrot.slane %v819_v20, 2 }
  0xca   :  { %v483_v35 = vmul.f32 %v2732_v57, %v482_v60  ;;  %3658 = vst [vmem:[#allocation14_spill] sm:$0xff] %v2765_v46  ;;  %v826_v29 = vadd.f32 %v825_v13, %v824_v9  ;;  %v466_v37 = vmul.f32 %v2699_v22, %v465_v21  ;;  %v423_v62 = vadd.f32 %v422_v23, %v421_v26 }
  0xcb   :  { %3659 = vst [vmem:[#allocation15_spill] sm:$0xff] %v2768_v47  ;;  %v831_v51 = vadd.f32 %v2751_v28, %v2758_v41  ;;  %v2774_v25 = vadd.f32 %v722_v44, %v2709_v40  ;;  %v493_v27 = vmul.f32 %v2746_v10, %v492_v36  ;;  %v821_v6 = vadd.f32 %v820_v56, %v819_v20  ;;  %v742_v36 = vpop.f32.mrf.mxu0  ;;  %v765_v44 = vpop.f32.mrf.mxu1 }
  0xcc   :  { %v484_v5 = vmul.f32 0.5, %v483_v35  ;;  %v827_v8 = vrot.slane %v826_v29, 2  ;;  %vm478_vm5 = vweird.f32 %v2702_v39  ;;  %v430_v16 = vadd.f32 %v429_v45, %v428_v12 }
  0xcd   :  { %v832_v60 = vrot.slane %v831_v51, 4  ;;  %v838_v59 = vadd.f32 %v2774_v25, %v2761_v38  ;;  %v476_v26 = vmul.f32 %v2702_v39, %v475_v52  ;;  %v433_v9 = vadd.f32 %v432_v53, %v431_v17  ;;  %vm479_vm8 = vmor %vm477_vm3, %vm478_vm5 }
  0xce   :  { %v387_v61 = vmul.f32 %v2765_v46, %v2765_v46  ;;  %v388_v14 = vmul.f32 %v2768_v47, %v2768_v47  ;;  %vm487_vm7 = vweird.f32 %v2696_v18  ;;  %v449_v12 = vmul.f32 %v423_v62, %v2589_v11 }
  0xcf   :  { %v822_v15 = vrot.slane %v821_v6, 1  ;;  %v828_v20 = vadd.f32 %v827_v8, %v826_v29  ;;  %v833_v13 = vadd.f32 %v832_v60, %v831_v51  ;;  %v470_v17 = vsel %vm469_vm6, %v2699_v22, %v466_v37 }
  0xd0   :  { %v485_v21 = vsub.f32 1.5, %v484_v5  ;;  %v494_v23 = vmul.f32 0.5, %v493_v27  ;;  %v839_v35 = vrot.slane %v838_v59, 4  ;;  %v450_v3 = vmul.f32 %v430_v16, %v2589_v11 }
  0xd1   :  { %v823_v45 = vadd.f32 %v822_v15, %v821_v6  ;;  %v829_v52 = vrot.slane %v828_v20, 1  ;;  %v834_v53 = vrot.slane %v833_v13, 2  ;;  %v480_v56 = vsel %vm479_vm8, %v2702_v39, %v476_v26 }
  0xd2   :  { %vm488_vm9 = vweird.f32 %v2732_v57  ;;  %v434_v22 = vrot.slane %v433_v9, 2  ;;  %v438_v29 = vadd.f32 %v388_v14, %v387_v61  ;;  %v840_v5 = vadd.f32 %v839_v35, %v838_v59 }
  0xd3   :  { %v873_v37 = vmul.f32 %v823_v45, %v2589_v11  ;;  %v830_v62 = vadd.f32 %v829_v52, %v828_v20  ;;  %v835_v51 = vadd.f32 %v834_v53, %v833_v13  ;;  %v2801_v27 = vmul.f32 %v470_v17, %v2605_v30  ;;  %vm489_vm12 = vmor %vm487_vm7, %vm488_vm9  ;;  %v768_v35 = vpop.f32.mrf.mxu1  ;;  %v788_v52 = vpop.f32.mrf.mxu2 }
  0xd4   :  { %v2804_v58 = vmul.f32 %v470_v17, %v2607_v31  ;;  %v495_v6 = vsub.f32 1.5, %v494_v23  ;;  %vm498_vm10 = vweird.f32 %v2746_v10  ;;  %v2807_v8 = vadd.f32 1e-05, %v449_v12  ;;  %v745_v23 = vpop.f32.mrf.mxu0 }
  0xd5   :  { %v486_v39 = vmul.f32 %v2732_v57, %v485_v21  ;;  %v2810_v16 = vadd.f32 1e-05, %v450_v3  ;;  %v2813_v60 = vsub.f32 %v2723_v50, %v873_v37  ;;  %v2816_v59 = vsub.f32 %v2712_v43, %v873_v37 }
  0xd6   :  { %v2819_v30 = vmul.f32 %v480_v56, %v2609_v32  ;;  %vm497_vm11 = vweird.f32 %v2707_v42  ;;  %v439_v31 = vrot.slane %v438_v29, 4  ;;  %v874_v26 = vmul.f32 %v830_v62, %v2589_v11  ;;  %v811_v42 = vpop.f32.mrf.mxu3 }
  0xd7   :  { %3660 = vst [vmem:[#allocation16_spill] sm:$0xff] %v2810_v16  ;;  %v836_v61 = vrot.slane %v835_v51, 1  ;;  %v435_v14 = vadd.f32 %v434_v22, %v433_v9  ;;  %v897_v12 = vmul.f32 %v2813_v60, %v2813_v60  ;;  %v898_v50 = vmul.f32 %v2816_v59, %v2816_v59  ;;  %v2852_v22 = vpop.permute.xlu2 %1088  ;;  %vm499_vm13 = vmor %vm497_vm11, %vm498_vm10 }
  0xd8   :  { %v841_v15 = vrot.slane %v840_v5, 2  ;;  %2231 = vrsqrt.f32 %v2807_v8  ;;  %v2833_v32 = vsub.f32 %v2740_v7, %v874_v26  ;;  %v2836_v43 = vsub.f32 %v2730_v4, %v874_v26 }
  0xd9   :  { %v837_v9 = vadd.f32 %v836_v61, %v835_v51  ;;  %v2839_v20 = vmul.f32 %v480_v56, %v2611_v34  ;;  %v490_v13 = vsel %vm489_vm12, %v2732_v57, %v486_v39  ;;  %v496_v17 = vmul.f32 %v2746_v10, %v495_v6 }
  0xda   :  { %2233 = vrsqrt.f32 %v2810_v16  ;;  %v913_v18 = vadd.f32 %v898_v50, %v897_v12  ;;  %v899_v21 = vmul.f32 %v2833_v32, %v2833_v32  ;;  %v900_v7 = vmul.f32 %v2836_v43, %v2836_v43 }
  0xdb   :  { %v875_v4 = vmul.f32 %v837_v9, %v2589_v11  ;;  %v436_v3 = vrot.slane %v435_v14, 1  ;;  %v440_v34 = vadd.f32 %v439_v31, %v438_v29  ;;  %v842_v45 = vadd.f32 %v841_v15, %v840_v5 }
  0xdc   :  { %v2850_v57 = vadd.f32 %v742_v36, %v2687_v19  ;;  %v914_v53 = vrot.slane %v913_v18, 4  ;;  %v920_v56 = vadd.f32 %v900_v7, %v899_v21  ;;  %v2861_v6 = vadd.f32 %v765_v44, %v2687_v19 }
  0xdd   :  { %v2855_v37 = vsub.f32 %v2758_v41, %v875_v4  ;;  %v2858_v62 = vsub.f32 %v2751_v28, %v875_v4  ;;  %v843_v51 = vrot.slane %v842_v45, 1  ;;  %v2864_v29 = vadd.f32 %v745_v23, %v2709_v40 }
  0xde   :  { %v2867_v36 = vadd.f32 %v768_v35, %v2709_v40  ;;  %v2869_v5 = vpop.eup %2231  ;;  %v915_v39 = vadd.f32 %v914_v53, %v913_v18  ;;  %v921_v31 = vrot.slane %v920_v56, 4  ;;  %v2878_v44 = vmul.f32 %v490_v13, %v2634_v63 }
  0xdf   :  { %v901_v41 = vmul.f32 %v2855_v37, %v2855_v37  ;;  %v902_v28 = vmul.f32 %v2858_v62, %v2858_v62  ;;  %v2881_v61 = vmul.f32 %v490_v13, %v2637_v0  ;;  %v844_v12 = vadd.f32 %v843_v51, %v842_v45 }
  0xe0   :  { %v2875_v26 = vpop.eup %2233  ;;  %v845_v50 = vadd.f32 %v2864_v29, %v2850_v57  ;;  %v2890_v15 = vsel %vm499_vm13, %v2746_v10, %v496_v17  ;;  %v916_v9 = vrot.slane %v915_v39, 2  ;;  %v922_v18 = vadd.f32 %v921_v31, %v920_v56 }
  0xe1   :  { %v852_v63 = vadd.f32 %v2867_v36, %v2861_v6  ;;  %v502_v0 = vmul.f32 %v2869_v5, %v2807_v8  ;;  %v927_v13 = vadd.f32 %v902_v28, %v901_v41  ;;  %v876_v21 = vmul.f32 %v844_v12, %v2589_v11  ;;  %v791_v12 = vpop.f32.mrf.mxu2 }
  0xe2   :  { %v846_v7 = vrot.slane %v845_v50, 4  ;;  %v437_v4 = vadd.f32 %v436_v3, %v435_v14  ;;  %v441_v23 = vrot.slane %v440_v34, 2  ;;  %v917_v35 = vadd.f32 %v916_v9, %v915_v39 }
  0xe3   :  { %v923_v45 = vrot.slane %v922_v18, 2  ;;  %v2899_v10 = vmul.f32 %v2890_v15, %v2640_v1  ;;  %v928_v17 = vrot.slane %v927_v13, 4  ;;  %v2902_v53 = vsub.f32 %v2761_v38, %v876_v21 }
  0xe4   :  { %v2905_v56 = vsub.f32 %v2774_v25, %v876_v21  ;;  %v918_v51 = vrot.slane %v917_v35, 1  ;;  %v847_v41 = vadd.f32 %v846_v7, %v845_v50  ;;  %v853_v28 = vrot.slane %v852_v63, 4 }
  0xe5   :  { %v924_v31 = vadd.f32 %v923_v45, %v922_v18  ;;  %v503_v14 = vmul.f32 %v2869_v5, %v502_v0  ;;  %v929_v3 = vadd.f32 %v928_v17, %v927_v13  ;;  %v903_v39 = vmul.f32 %v2902_v53, %v2902_v53  ;;  %v2915_v18 = vpop.permute.xlu2 %1114 }
  0xe6   :  { %v904_v1 = vmul.f32 %v2905_v56, %v2905_v56  ;;  %v512_v38 = vmul.f32 %v2875_v26, %v2810_v16  ;;  %v451_v25 = vmul.f32 %v437_v4, %v2589_v11  ;;  %v442_v9 = vadd.f32 %v441_v23, %v440_v34  ;;  %v2924_v23 = vpop.permute.xlu0 %1083 }
  0xe7   :  { %v919_v21 = vadd.f32 %v918_v51, %v917_v35  ;;  %v925_v50 = vrot.slane %v924_v31, 1  ;;  %v930_v7 = vrot.slane %v929_v3, 2  ;;  %v848_v13 = vrot.slane %v847_v41, 2 }
  0xe8   :  { %v934_v0 = vadd.f32 %v904_v1, %v903_v39  ;;  %v2919_v17 = vadd.f32 %v788_v52, %v2687_v19  ;;  %v854_v47 = vadd.f32 %v853_v28, %v852_v63  ;;  %v2922_v46 = vadd.f32 %v791_v12, %v2709_v40  ;;  %v814_v28 = vpop.f32.mrf.mxu3 }
  0xe9   :  { %v969_v45 = vmul.f32 %v919_v21, %v2589_v11  ;;  %v926_v24 = vadd.f32 %v925_v50, %v924_v31  ;;  %v931_v33 = vadd.f32 %v930_v7, %v929_v3  ;;  %v849_v34 = vadd.f32 %v848_v13, %v847_v41 }
  0xea   :  { %v935_v4 = vrot.slane %v934_v0, 4  ;;  %v443_v35 = vrot.slane %v442_v9, 1  ;;  %v855_v39 = vrot.slane %v854_v47, 2  ;;  %v859_v1 = vadd.f32 %v2922_v46, %v2919_v17 }
  0xeb   :  { %v2926_v51 = vadd.f32 1e-05, %v969_v45  ;;  %v2930_v21 = vmul.f32 0.5, %v503_v14  ;;  %v2933_v52 = vmul.f32 %v2875_v26, %v512_v38  ;;  %v970_v63 = vmul.f32 %v926_v24, %v2589_v11 }
  0xec   :  { %v932_v31 = vrot.slane %v931_v33, 1  ;;  %v2936_v3 = vadd.f32 1e-05, %v451_v25  ;;  %v936_v41 = vadd.f32 %v935_v4, %v934_v0  ;;  %v850_v12 = vrot.slane %v849_v34, 1 }
  0xed   :  { %2235 = vrsqrt.f32 %v2926_v51  ;;  %v2939_v50 = vadd.f32 1e-05, %v970_v63  ;;  %v856_v13 = vadd.f32 %v855_v39, %v854_v47  ;;  %v860_v45 = vrot.slane %v859_v1, 4  ;;  %v2951_v47 = vpop.permute.xlu2 %559 }
  0xee   :  { %v933_v7 = vadd.f32 %v932_v31, %v931_v33  ;;  %v444_v14 = vadd.f32 %v443_v35, %v442_v9  ;;  %v937_v55 = vrot.slane %v936_v41, 2  ;;  %v851_v49 = vadd.f32 %v850_v12, %v849_v34 }
  0xef   :  { %v2942_v38 = vadd.f32 %v814_v28, %v2709_v40  ;;  %2237 = vrsqrt.f32 %v2939_v50  ;;  %v2947_v25 = vadd.f32 %v811_v42, %v2687_v19  ;;  %v857_v0 = vrot.slane %v856_v13, 1  ;;  %v2971_v28 = vpop.permute.xlu0 %585 }
  0xf0   :  { %v971_v24 = vmul.f32 %v933_v7, %v2589_v11  ;;  %2239 = vrsqrt.f32 %v2936_v3  ;;  %v938_v4 = vadd.f32 %v937_v55, %v936_v41  ;;  %v877_v33 = vmul.f32 %v851_v49, %v2589_v11 }
  0xf1   :  { %v861_v9 = vadd.f32 %v860_v45, %v859_v1  ;;  %v858_v40 = vadd.f32 %v857_v0, %v856_v13  ;;  %v866_v35 = vadd.f32 %v2942_v38, %v2947_v25  ;;  %v567_v39 = vmul.f32 %v2951_v47, %v2801_v27 }
  0xf2   :  { %v2953_v34 = vadd.f32 1e-05, %v971_v24  ;;  %v939_v42 = vrot.slane %v938_v4, 1  ;;  %v2960_v63 = vsub.f32 %v2850_v57, %v877_v33  ;;  %v2963_v55 = vsub.f32 %v2864_v29, %v877_v33 }
  0xf3   :  { %v2236_v19 = vpop.eup %2235  ;;  %v862_v49 = vrot.slane %v861_v9, 2  ;;  %v2966_v1 = vmul.f32 %v444_v14, %v2589_v11  ;;  %vm991_vm14 = vweird.f32 %v2926_v51  ;;  %v878_v41 = vmul.f32 %v858_v40, %v2589_v11 }
  0xf4   :  { %3661 = vst [vmem:[#allocation17_spill] sm:$0xff] %v2960_v63  ;;  %v986_v31 = vmul.f32 %v2236_v19, %v2926_v51  ;;  %2241 = vrsqrt.f32 %v2953_v34  ;;  %v940_v27 = vadd.f32 %v939_v42, %v938_v4  ;;  %v905_v57 = vmul.f32 %v2960_v63, %v2960_v63 }
  0xf5   :  { %3662 = vst [vmem:[#allocation18_spill] sm:$0xff] %v2963_v55  ;;  %v906_v29 = vmul.f32 %v2963_v55, %v2963_v55  ;;  %v2238_v12 = vpop.eup %2237  ;;  %v863_v13 = vadd.f32 %v862_v49, %v861_v9  ;;  %v867_v45 = vrot.slane %v866_v35, 4  ;;  %v2979_v14 = vadd.f32 %v2971_v28, %v567_v39 }
  0xf6   :  { %v987_v7 = vmul.f32 %v2236_v19, %v986_v31  ;;  %v2981_v24 = vpop.eup %2239  ;;  %vm992_vm15 = vweird.f32 %v2236_v19  ;;  %v996_v0 = vmul.f32 %v2238_v12, %v2939_v50  ;;  %vm1001_vm1 = vweird.f32 %v2939_v50 }
  0xf7   :  { %v972_v4 = vmul.f32 %v940_v27, %v2589_v11  ;;  %v941_v33 = vadd.f32 %v906_v29, %v905_v57  ;;  %v2987_v40 = vsub.f32 %v2861_v6, %v878_v41  ;;  %v2990_v9 = vsub.f32 %v2867_v36, %v878_v41  ;;  %vm993_vm4 = vmor %vm991_vm14, %vm992_vm15 }
  0xf8   :  { %v988_v42 = vmul.f32 0.5, %v987_v7  ;;  %v864_v49 = vrot.slane %v863_v13, 1  ;;  %v997_v39 = vmul.f32 %v2238_v12, %v996_v0  ;;  %v868_v48 = vadd.f32 %v867_v45, %v866_v35 }
  0xf9   :  { %3663 = vst [vmem:[#allocation19_spill] sm:$0xff] %v2990_v9  ;;  %v2992_v31 = vadd.f32 1e-05, %v972_v4  ;;  %v942_v54 = vrot.slane %v941_v33, 4  ;;  %v907_v16 = vmul.f32 %v2987_v40, %v2987_v40  ;;  %v908_v27 = vmul.f32 %v2990_v9, %v2990_v9 }
  0xfa   :  { %v2242_v63 = vpop.eup %2241  ;;  %v989_v55 = vsub.f32 1.5, %v988_v42  ;;  %v865_v57 = vadd.f32 %v864_v49, %v863_v13  ;;  %v998_v6 = vmul.f32 0.5, %v997_v39  ;;  %vm1011_vm2 = vweird.f32 %v2953_v34 }
  0xfb   :  { %v1006_v29 = vmul.f32 %v2242_v63, %v2953_v34  ;;  %2243 = vrsqrt.f32 %v2992_v31  ;;  %vm1002_vm3 = vweird.f32 %v2238_v12  ;;  %v943_v41 = vadd.f32 %v942_v54, %v941_v33 }
  0xfc   :  { %v990_v36 = vmul.f32 %v2236_v19, %v989_v55  ;;  %v948_v35 = vadd.f32 %v908_v27, %v907_v16  ;;  %v999_v7 = vsub.f32 1.5, %v998_v6  ;;  %v879_v0 = vmul.f32 %v865_v57, %v2589_v11  ;;  %vm1003_vm6 = vmor %vm1001_vm1, %vm1002_vm3 }
  0xfd   :  { %v1007_v45 = vmul.f32 %v2242_v63, %v1006_v29  ;;  %v869_v13 = vrot.slane %v868_v48, 2  ;;  %vm1012_vm5 = vweird.f32 %v2242_v63  ;;  %v944_v42 = vrot.slane %v943_v41, 2 }
  0xfe   :  { %v994_v4 = vsel %vm993_vm4, %v2236_v19, %v990_v36  ;;  %v949_v49 = vrot.slane %v948_v35, 4  ;;  %v1000_v9 = vmul.f32 %v2238_v12, %v999_v7  ;;  %v3011_v33 = vsub.f32 %v2919_v17, %v879_v0  ;;  %vm1013_vm9 = vmor %vm1011_vm2, %vm1012_vm5 }
  0xff   :  { %v1065_v39 = vmul.f32 %v994_v4, %v2813_v60  ;;  %v1066_v55 = vmul.f32 %v994_v4, %v2816_v59  ;;  %v1008_v54 = vmul.f32 0.5, %v1007_v45  ;;  %v945_v16 = vadd.f32 %v944_v42, %v943_v41 }
 0x100   :  { %v950_v51 = vadd.f32 %v949_v49, %v948_v35  ;;  %v3014_v19 = vsub.f32 %v2922_v46, %v879_v0  ;;  %v1004_v57 = vsel %vm1003_vm6, %v2238_v12, %v1000_v9  ;;  %v870_v60 = vadd.f32 %v869_v13, %v868_v48  ;;  %v3030_v13 = vpop.permute.xlu1 %1109 }
 0x101   :  { %v2244_v27 = vpop.eup %2243  ;;  %v1009_v6 = vsub.f32 1.5, %v1008_v54  ;;  %v1092_v59 = vmul.f32 %v2852_v22, %v1066_v55  ;;  %v1067_v29 = vmul.f32 %v1004_v57, %v2833_v32  ;;  %v1068_v36 = vmul.f32 %v1004_v57, %v2836_v43 }
 0x102   :  { %v1016_v50 = vmul.f32 %v2244_v27, %v2992_v31  ;;  %vm1021_vm7 = vweird.f32 %v2992_v31  ;;  %vm1022_vm8 = vweird.f32 %v2244_v27  ;;  %v946_v41 = vrot.slane %v945_v16, 1 }
 0x103   :  { %v1010_v17 = vmul.f32 %v2242_v63, %v1009_v6  ;;  %v951_v35 = vrot.slane %v950_v51, 2  ;;  %v909_v46 = vmul.f32 %v3011_v33, %v3011_v33  ;;  %v910_v32 = vmul.f32 %v3014_v19, %v3014_v19  ;;  %vm1023_vm10 = vmor %vm1021_vm7, %vm1022_vm8 }
 0x104   :  { %v1017_v48 = vmul.f32 %v2244_v27, %v1016_v50  ;;  %v871_v43 = vrot.slane %v870_v60, 1  ;;  %v1118_v12 = vadd.f32 %v2915_v18, %v1092_v59  ;;  %v947_v7 = vadd.f32 %v946_v41, %v945_v16 }
 0x105   :  { %v1014_v9 = vsel %vm1013_vm9, %v2242_v63, %v1010_v17  ;;  %v952_v45 = vadd.f32 %v951_v35, %v950_v51  ;;  %v1094_v0 = vmul.f32 %v2852_v22, %v1068_v36  ;;  %v955_v49 = vadd.f32 %v910_v32, %v909_v46 }
 0x106   :  { %v1069_v4 = vmul.f32 %v1014_v9, %v2855_v37  ;;  %v1070_v42 = vmul.f32 %v1014_v9, %v2858_v62  ;;  %v1018_v34 = vmul.f32 0.5, %v1017_v48  ;;  %1147 = vmatpush.xpose.msra.mxu0 %v1118_v12  ;;  %v973_v55 = vmul.f32 %v947_v7, %v2589_v11 }
 0x107   :  { %v953_v54 = vrot.slane %v952_v45, 1  ;;  %v872_v57 = vadd.f32 %v871_v43, %v870_v60  ;;  %v1120_v6 = vadd.f32 %v2915_v18, %v1094_v0  ;;  %v956_v51 = vrot.slane %v955_v49, 4 }
 0x108   :  { %v1096_v63 = vmul.f32 %v2852_v22, %v1070_v42  ;;  %v1019_v16 = vsub.f32 1.5, %v1018_v34  ;;  %v1091_v59 = vmul.f32 %v2924_v23, %v1065_v39  ;;  %v3038_v36 = vadd.f32 1e-05, %v973_v55  ;;  %v3075_v42 = vpop.permute.xlu1 %564 }
 0x109   :  { %v954_v37 = vadd.f32 %v953_v54, %v952_v45  ;;  %v880_v62 = vmul.f32 %v872_v57, %v2589_v11  ;;  %1170 = vmatpush.xpose.msra.mxu1 %v1120_v6  ;;  %v1093_v50 = vmul.f32 %v2924_v23, %v1067_v29  ;;  %v957_v41 = vadd.f32 %v956_v51, %v955_v49  ;;  %v3088_v51 = vpop.permute.xlu2 %590 }
 0x10a   :  { %v1020_v17 = vmul.f32 %v2244_v27, %v1019_v16  ;;  %v1117_v60 = vadd.f32 %v3030_v13, %v1091_v59  ;;  %v1122_v35 = vadd.f32 %v2915_v18, %v1096_v63  ;;  %2245 = vrsqrt.f32 %v3038_v36 }
 0x10b   :  { %v974_v39 = vmul.f32 %v954_v37, %v2589_v11  ;;  %v3050_v46 = vsub.f32 %v2947_v25, %v880_v62  ;;  %v569_v29 = vmul.f32 %v2951_v47, %v2819_v30  ;;  %v958_v32 = vrot.slane %v957_v41, 2 }
 0x10c   :  { %v1024_v48 = vsel %vm1023_vm10, %v2244_v27, %v1020_v17  ;;  %v3055_v43 = vsub.f32 %v2942_v38, %v880_v62  ;;  %1148 = vmatpush.xpose.msra.mxu0 %v1117_v60  ;;  %v1119_v12 = vadd.f32 %v3030_v13, %v1093_v50  ;;  %1193 = vmatpush.xpose.msra.mxu2 %v1122_v35  ;;  %v505_v30 = vsub.f32 1.5, %v2930_v21 }
 0x10d   :  { %v1071_v31 = vmul.f32 %v1024_v48, %v2902_v53  ;;  %v1072_v9 = vmul.f32 %v1024_v48, %v2905_v56  ;;  %v3060_v7 = vadd.f32 1e-05, %v974_v39  ;;  %v911_v25 = vmul.f32 %v3050_v46, %v3050_v46 }
 0x10e   :  { %v959_v27 = vadd.f32 %v958_v32, %v957_v41  ;;  %v912_v38 = vmul.f32 %v3055_v43, %v3055_v43  ;;  %1171 = vmatpush.xpose.msra.mxu1 %v1119_v12  ;;  %v1095_v45 = vmul.f32 %v2924_v23, %v1069_v4  ;;  %v595_v53 = vadd.f32 %v2971_v28, %v569_v29 }
 0x10f   :  { %v1098_v0 = vmul.f32 %v2852_v22, %v1072_v9  ;;  %2247 = vrsqrt.f32 %v3060_v7  ;;  %1149 = vmatmul.f32.vlgmr.msra.gmra.mxu0 %v2979_v14  ;;  %v571_v56 = vmul.f32 %v2951_v47, %v2878_v44  ;;  %v514_v21 = vmul.f32 0.5, %v2933_v52 }
 0x110   :  { %v960_v34 = vrot.slane %v959_v27, 1  ;;  %v962_v49 = vadd.f32 %v912_v38, %v911_v25  ;;  %v1121_v55 = vadd.f32 %v3030_v13, %v1095_v45  ;;  %v2246_v4 = vpop.eup %2245  ;;  %v3079_v54 = vadd.f32 1e-05, %v2966_v1 }
 0x111   :  { %v1124_v57 = vadd.f32 %v2915_v18, %v1098_v0  ;;  %1172 = vmatmul.f32.vlgmr.msra.gmra.mxu1 %v595_v53  ;;  %v1097_v14 = vmul.f32 %v2924_v23, %v1071_v31  ;;  %v568_v44 = vmul.f32 %v3075_v42, %v2804_v58  ;;  %v548_v52 = vmul.f32 %v2890_v15, %v2643_v2 }
 0x112   :  { %v1026_v6 = vmul.f32 %v2246_v4, %v3038_v36  ;;  %v961_v63 = vadd.f32 %v960_v34, %v959_v27  ;;  %v963_v16 = vrot.slane %v962_v49, 4  ;;  %1194 = vmatpush.xpose.msra.mxu2 %v1121_v55  ;;  %v506_v1 = vmul.f32 %v2869_v5, %v505_v30 }
 0x113   :  { %vm508_vm11 = vweird.f32 %v2869_v5  ;;  %1216 = vmatpush.xpose.msra.mxu3 %v1124_v57  ;;  %v597_v59 = vadd.f32 %v2971_v28, %v571_v56  ;;  %v570_v58 = vmul.f32 %v3075_v42, %v2839_v20  ;;  %v573_v62 = vmul.f32 %v2951_v47, %v2899_v10 }
 0x114   :  { %v1027_v37 = vmul.f32 %v2246_v4, %v1026_v6  ;;  %v975_v2 = vmul.f32 %v961_v63, %v2589_v11  ;;  %v964_v15 = vadd.f32 %v963_v16, %v962_v49  ;;  %v515_v17 = vsub.f32 1.5, %v514_v21  ;;  %v3664_v49 = vld [vmem:[#allocation16_spill] sm:$0xff] }
 0x115   :  { %v2248_v50 = vpop.eup %2247  ;;  %2249 = vrsqrt.f32 %v3079_v54  ;;  %v1123_v41 = vadd.f32 %v3030_v13, %v1097_v14  ;;  %1195 = vmatmul.f32.vlgmr.msra.gmra.mxu2 %v597_v59  ;;  %v594_v60 = vadd.f32 %v3088_v51, %v568_v44  ;;  %v522_v35 = vmul.f32 %v2981_v24, %v2936_v3  ;;  %v3666_v44 = vld [vmem:[#allocation17_spill] sm:$0xff] }
 0x116   :  { %v1028_v20 = vmul.f32 0.5, %v1027_v37  ;;  %v1036_v39 = vmul.f32 %v2248_v50, %v3060_v7  ;;  %v3104_v29 = vadd.f32 1e-05, %v975_v2  ;;  %vm1032_vm12 = vweird.f32 %v2246_v4 }
 0x117   :  { %v965_v48 = vrot.slane %v964_v15, 2  ;;  %1217 = vmatpush.xpose.msra.mxu3 %v1123_v41  ;;  %1152 = vmatmul.f32.gmra.mxu0 %v594_v60  ;;  %v596_v10 = vadd.f32 %v3088_v51, %v570_v58  ;;  %v572_v32 = vmul.f32 %v3075_v42, %v2881_v61  ;;  %v599_v9 = vadd.f32 %v2971_v28, %v573_v62 }
 0x118   :  { %v1029_v12 = vsub.f32 1.5, %v1028_v20  ;;  %v1037_v31 = vmul.f32 %v2248_v50, %v1036_v39  ;;  %2251 = vrsqrt.f32 %v3104_v29  ;;  %vm507_vm13 = vweird.f32 %v2807_v8 }
 0x119   :  { %vm518_vm14 = vweird.f32 %v2875_v26  ;;  %v966_v25 = vadd.f32 %v965_v48, %v964_v15  ;;  %1175 = vmatmul.f32.gmra.mxu1 %v596_v10  ;;  %vm509_vm15 = vmor %vm507_vm13, %vm508_vm11  ;;  %v523_v30 = vmul.f32 %v2981_v24, %v522_v35  ;;  %vm1031_vm1 = vweird.f32 %v3038_v36  ;;  %v3665_v36 = vld [vmem:[#allocation18_spill] sm:$0xff] }
 0x11a   :  { %v1030_v27 = vmul.f32 %v2246_v4, %v1029_v12  ;;  %v1038_v61 = vmul.f32 0.5, %v1037_v31  ;;  %1218 = vmatmul.f32.vlgmr.msra.gmra.mxu3 %v599_v9  ;;  %v510_v45 = vsel %vm509_vm15, %v2869_v5, %v506_v1  ;;  %v516_v8 = vmul.f32 %v2875_v26, %v515_v17  ;;  %vm1033_vm2 = vmor %vm1031_vm1, %vm1032_vm12  ;;  %v3669_v10 = vld [vmem:[#allocation10_spill] sm:$0xff] }
 0x11b   :  { %v3117_v38 = vpop.eup %2249  ;;  %v967_v0 = vrot.slane %v966_v25, 1  ;;  %v598_v53 = vadd.f32 %v3088_v51, %v572_v32  ;;  %vm1042_vm3 = vweird.f32 %v2248_v50  ;;  %v574_v34 = vmul.f32 %v3075_v42, %v548_v52 }
 0x11c   :  { %v1034_v56 = vsel %vm1033_vm2, %v2246_v4, %v1030_v27  ;;  %v1039_v21 = vsub.f32 1.5, %v1038_v61  ;;  %vm517_vm4 = vweird.f32 %v3664_v49  ;;  %v524_v5 = vmul.f32 0.5, %v523_v30  ;;  %v3667_v4 = vld [vmem:[#allocation8_spill] sm:$0xff]  ;;  %v3670_v61 = vld [vmem:[#allocation9_spill] sm:$0xff] }
 0x11d   :  { %v1074_v55 = vmul.f32 %v1034_v56, %v3665_v36  ;;  %v968_v57 = vadd.f32 %v967_v0, %v966_v25  ;;  %1198 = vmatmul.f32.gmra.mxu2 %v598_v53  ;;  %vm519_vm5 = vmor %vm517_vm4, %vm518_vm14  ;;  %v1073_v6 = vmul.f32 %v1034_v56, %v3666_v44  ;;  %vm1041_vm6 = vweird.f32 %v3060_v7  ;;  %v3668_v7 = vld [vmem:[#allocation19_spill] sm:$0xff] }
 0x11e   :  { %v2252_v14 = vpop.eup %2251  ;;  %v1040_v63 = vmul.f32 %v2248_v50, %v1039_v21  ;;  %v549_v16 = vmul.f32 %v510_v45, %v3667_v4  ;;  %vm1043_vm7 = vmor %vm1041_vm6, %vm1042_vm3  ;;  %v520_v58 = vsel %vm519_vm5, %v2875_v26, %v516_v8  ;;  %v532_v37 = vmul.f32 %v3117_v38, %v3079_v54 }
 0x11f   :  { %v1100_v52 = vmul.f32 %v2852_v22, %v1074_v55  ;;  %v1046_v1 = vmul.f32 %v2252_v14, %v3104_v29  ;;  %v976_v59 = vmul.f32 %v968_v57, %v2589_v11  ;;  %v600_v15 = vadd.f32 %v3088_v51, %v574_v34 }
 0x120   :  { %v1044_v2 = vsel %vm1043_vm7, %v2248_v50, %v1040_v63  ;;  %v525_v35 = vsub.f32 1.5, %v524_v5  ;;  %v1099_v39 = vmul.f32 %v2924_v23, %v1073_v6  ;;  %v551_v50 = vmul.f32 %v520_v58, %v3669_v10  ;;  %v3672_v6 = vld [vmem:[#allocation12_spill] sm:$0xff] }
 0x121   :  { %v1075_v62 = vmul.f32 %v1044_v2, %v2987_v40  ;;  %v1076_v17 = vmul.f32 %v1044_v2, %v3668_v7  ;;  %v1047_v41 = vmul.f32 %v2252_v14, %v1046_v1  ;;  %v984_v60 = vadd.f32 1e-05, %v976_v59 }
 0x122   :  { %v1126_v20 = vadd.f32 %v2915_v18, %v1100_v52  ;;  %1221 = vmatmul.f32.gmra.mxu3 %v600_v15  ;;  %v533_v32 = vmul.f32 %v3117_v38, %v532_v37  ;;  %v575_v40 = vmul.f32 %v2951_v47, %v549_v16  ;;  %vm1052_vm8 = vweird.f32 %v2252_v14 }
 0x123   :  { %v1102_v26 = vmul.f32 %v2852_v22, %v1076_v17  ;;  %v1048_v48 = vmul.f32 0.5, %v1047_v41  ;;  %2253 = vrsqrt.f32 %v984_v60  ;;  %v1101_v9 = vmul.f32 %v2924_v23, %v1075_v62  ;;  %v3673_v62 = vld [vmem:[#allocation13_spill] sm:$0xff] }
 0x124   :  { %1239 = vmatpush.xpose.msrb.mxu0 %v1126_v20  ;;  %v526_v25 = vmul.f32 %v2981_v24, %v525_v35  ;;  %vm528_vm9 = vweird.f32 %v2981_v24  ;;  %v1125_v30 = vadd.f32 %v3030_v13, %v1099_v39  ;;  %vm1051_vm10 = vweird.f32 %v3104_v29 }
 0x125   :  { %v1049_v12 = vsub.f32 1.5, %v1048_v48  ;;  %v1128_v31 = vadd.f32 %v2915_v18, %v1102_v26  ;;  %v550_v8 = vmul.f32 %v510_v45, %v3670_v61  ;;  %vm527_vm11 = vweird.f32 %v2936_v3  ;;  %vm1053_vm12 = vmor %vm1051_vm10, %vm1052_vm8  ;;  %v3671_v3 = vld [vmem:[#allocation11_spill] sm:$0xff]  ;;  %v3674_v26 = vld [vmem:[#allocation14_spill] sm:$0xff] }
 0x126   :  { %v577_v0 = vmul.f32 %v2951_v47, %v551_v50  ;;  %vm529_vm13 = vmor %vm527_vm11, %vm528_vm9  ;;  %v534_v56 = vmul.f32 0.5, %v533_v32  ;;  %v1127_v34 = vadd.f32 %v3030_v13, %v1101_v9  ;;  %v601_v49 = vadd.f32 %v2971_v28, %v575_v40  ;;  %v3675_v40 = vld [vmem:[#allocation15_spill] sm:$0xff] }
 0x127   :  { %v1050_v27 = vmul.f32 %v2252_v14, %v1049_v12  ;;  %1262 = vmatpush.xpose.msrb.mxu1 %v1128_v31  ;;  %v530_v36 = vsel %vm529_vm13, %v2981_v24, %v526_v25  ;;  %v552_v57 = vmul.f32 %v520_v58, %v3671_v3  ;;  %v576_v16 = vmul.f32 %v3075_v42, %v550_v8 }
 0x128   :  { %1240 = vmatpush.xpose.msrb.mxu0 %v1125_v30  ;;  %v553_v63 = vmul.f32 %v530_v36, %v3672_v6  ;;  %v535_v4 = vsub.f32 1.5, %v534_v56  ;;  %vm538_vm15 = vweird.f32 %v3117_v38  ;;  %vm1061_vm1 = vweird.f32 %v984_v60 }
 0x129   :  { %v2254_v53 = vpop.eup %2253  ;;  %v1054_v21 = vsel %vm1053_vm12, %v2252_v14, %v1050_v27  ;;  %v603_v14 = vadd.f32 %v2971_v28, %v577_v0  ;;  %v578_v1 = vmul.f32 %v3075_v42, %v552_v57  ;;  %v602_v37 = vadd.f32 %v3088_v51, %v576_v16 }
 0x12a   :  { %v1077_v29 = vmul.f32 %v1054_v21, %v3011_v33  ;;  %v1078_v45 = vmul.f32 %v1054_v21, %v3014_v19  ;;  %v1056_v55 = vmul.f32 %v2254_v53, %v984_v60  ;;  %vm1062_vm14 = vweird.f32 %v2254_v53 }
 0x12b   :  { %1263 = vmatpush.xpose.msrb.mxu1 %v1127_v34  ;;  %1241 = vmatmul.f32.vlgmr.msrb.gmra.mxu0 %v601_v49  ;;  %v536_v59 = vmul.f32 %v3117_v38, %v535_v4  ;;  %v579_v58 = vmul.f32 %v2951_v47, %v553_v63  ;;  %vm537_vm2 = vweird.f32 %v3079_v54  ;;  %vm1063_vm3 = vmor %vm1061_vm1, %vm1062_vm14  ;;  %v554_v7 = vmul.f32 %v530_v36, %v3673_v62 }
 0x12c   :  { %v1104_v5 = vmul.f32 %v2852_v22, %v1078_v45  ;;  %v1057_v44 = vmul.f32 %v2254_v53, %v1056_v55  ;;  %v1103_v19 = vmul.f32 %v2924_v23, %v1077_v29  ;;  %vm539_vm4 = vmor %vm537_vm2, %vm538_vm15  ;;  %v604_v41 = vadd.f32 %v3088_v51, %v578_v1 }
 0x12d   :  { %v540_v35 = vsel %vm539_vm4, %v3117_v38, %v536_v59  ;;  %v605_v60 = vadd.f32 %v2971_v28, %v579_v58  ;;  %v580_v32 = vmul.f32 %v3075_v42, %v554_v7 }
 0x12e   :  { %v1058_v24 = vmul.f32 0.5, %v1057_v44  ;;  %v1130_v33 = vadd.f32 %v2915_v18, %v1104_v5  ;;  %1264 = vmatmul.f32.vlgmr.msrb.gmra.mxu1 %v603_v14  ;;  %v1129_v15 = vadd.f32 %v3030_v13, %v1103_v19  ;;  %v555_v48 = vmul.f32 %v540_v35, %v3674_v26 }
 0x130   :  { %v1059_v52 = vsub.f32 1.5, %v1058_v24  ;;  %1285 = vmatpush.xpose.msrb.mxu2 %v1130_v33  ;;  %v581_v38 = vmul.f32 %v2951_v47, %v555_v48 }
 0x132   :  { %v1060_v2 = vmul.f32 %v2254_v53, %v1059_v52  ;;  %v607_v12 = vadd.f32 %v2971_v28, %v581_v38 }
 0x133   :  { %1244 = vmatmul.f32.gmra.mxu0 %v602_v37 }
 0x134   :  { %v1064_v17 = vsel %vm1063_vm3, %v2254_v53, %v1060_v2  ;;  %1286 = vmatpush.xpose.msrb.mxu2 %v1129_v15 }
 0x135   :  { %v1079_v20 = vmul.f32 %v1064_v17, %v3050_v46  ;;  %v1080_v39 = vmul.f32 %v1064_v17, %v3055_v43  ;;  %v606_v43 = vadd.f32 %v3088_v51, %v580_v32 }
 0x136   :  { %1267 = vmatmul.f32.gmra.mxu1 %v604_v41 }
 0x137   :  { %v1106_v54 = vmul.f32 %v2852_v22, %v1080_v39  ;;  %1287 = vmatmul.f32.vlgmr.msrb.gmra.mxu2 %v605_v60  ;;  %v1105_v50 = vmul.f32 %v2924_v23, %v1079_v20  ;;  %v556_v22 = vmul.f32 %v540_v35, %v3675_v40 }
 0x139   :  { %v1132_v10 = vadd.f32 %v2915_v18, %v1106_v54  ;;  %v1131_v46 = vadd.f32 %v3030_v13, %v1105_v50  ;;  %v582_v18 = vmul.f32 %v3075_v42, %v556_v22 }
 0x13b   :  { %1308 = vmatpush.xpose.msrb.mxu3 %v1132_v10  ;;  %v608_v23 = vadd.f32 %v3088_v51, %v582_v18 }
 0x13f   :  { %1309 = vmatpush.xpose.msrb.mxu3 %v1131_v46  ;;  %1290 = vmatmul.f32.gmra.mxu2 %v606_v43 }
 0x142   :  { %1310 = vmatmul.f32.vlgmr.msrb.gmra.mxu3 %v607_v12 }
 0x14a   :  { %1313 = vmatmul.f32.gmra.mxu3 %v608_v23 }
 0x18c   :  { %v1150_v31 = vpop.f32.mrf.mxu0 }
 0x18d   :  { %v1317_v9 = vsel %vm95_vm0, %v1150_v31, -inf }
 0x18e   :  { %v3193_v47 = vpop.f32.mrf.mxu1  ;;  %1318 = vmax.xlane.f32.xlu2 %v1317_v9 }
 0x18f   :  { %v1323_v34 = vsel %vm95_vm0, %v3193_v47, -inf }
 0x194   :  { %v1153_v13 = vpop.f32.mrf.mxu0 }
 0x195   :  { %v1320_v25 = vsel %vm95_vm0, %v1153_v13, -inf }
 0x196   :  { %v1176_v30 = vpop.f32.mrf.mxu1  ;;  %1321 = vmax.xlane.f32.xlu0 %v1320_v25 }
 0x197   :  { %v1326_v27 = vsel %vm95_vm0, %v1176_v30, -inf }
 0x198   :  { %1327 = vmax.xlane.f32.xlu1 %v1326_v27  ;;  %v1196_v28 = vpop.f32.mrf.mxu2 }
 0x199   :  { %v1329_v42 = vsel %vm95_vm0, %v1196_v28, -inf }
 0x19a   :  { %1330 = vmax.xlane.f32.xlu2 %v1329_v42 }
 0x19d   :  { %v1219_v51 = vpop.f32.mrf.mxu3 }
 0x19e   :  { %v1335_v8 = vsel %vm95_vm0, %v1219_v51, -inf }
 0x1a0   :  { %v3198_v61 = vpop.f32.mrf.mxu2 }
 0x1a1   :  { %v1332_v0 = vsel %vm95_vm0, %v3198_v61, -inf }
 0x1a2   :  { %1336 = vmax.xlane.f32.xlu2 %v1335_v8  ;;  %1333 = vmax.xlane.f32.xlu0 %v1332_v0 }
 0x1a5   :  { %v3203_v53 = vpop.f32.mrf.mxu3 }
 0x1a6   :  { %v1338_v56 = vsel %vm95_vm0, %v3203_v53, -inf }
 0x1a7   :  { %1339 = vmax.xlane.f32.xlu1 %v1338_v56 }
 0x1a8   :  { %v3207_v21 = vpop.f32.mrf.mxu0 }
 0x1a9   :  { %v1341_v16 = vsel %vm95_vm0, %v3207_v21, -inf }
 0x1aa   :  { %1324 = vmax.xlane.f32.xlu0 %v1323_v34 }
 0x1ab   :  { %v3215_v29 = vpop.f32.mrf.mxu1 }
 0x1ac   :  { %v1347_v24 = vsel %vm95_vm0, %v3215_v29, -inf }
 0x1b0   :  { %v3211_v49 = vpop.f32.mrf.mxu0 }
 0x1b1   :  { %v1344_v36 = vsel %vm95_vm0, %v3211_v49, -inf }
 0x1b2   :  { %1345 = vmax.xlane.f32.xlu2 %v1344_v36 }
 0x1b3   :  { %v3221_v3 = vpop.f32.mrf.mxu1 }
 0x1b4   :  { %v1350_v57 = vsel %vm95_vm0, %v3221_v3, -inf }
 0x1ba   :  { %v3217_v45 = vpop.f32.mrf.mxu2 }
 0x1bb   :  { %v1353_v55 = vsel %vm95_vm0, %v3217_v45, -inf }
 0x1bc   :  { %1354 = vmax.xlane.f32.xlu0 %v1353_v55 }
 0x1c2   :  { %v3229_v14 = vpop.f32.mrf.mxu2 }
 0x1c3   :  { %v1356_v6 = vsel %vm95_vm0, %v3229_v14, -inf }
 0x1c4   :  { %1351 = vmax.xlane.f32.xlu0 %v1350_v57 }
 0x1c5   :  { %v3225_v5 = vpop.f32.mrf.mxu3 }
 0x1c6   :  { %v1359_v44 = vsel %vm95_vm0, %v3225_v5, -inf }
 0x1c7   :  { %1360 = vmax.xlane.f32.xlu1 %v1359_v44 }
 0x1cd   :  { %v3233_v63 = vpop.f32.mrf.mxu3 }
 0x1ce   :  { %v1362_v4 = vsel %vm95_vm0, %v3233_v63, -inf }
 0x1cf   :  { %1357 = vmax.xlane.f32.xlu1 %v1356_v6  ;;  %1363 = vmax.xlane.f32.xlu2 %v1362_v4 }
 0x1d7   :  { %1342 = vmax.xlane.f32.xlu1 %v1341_v16  ;;  %1348 = vmax.xlane.f32.xlu2 %v1347_v24 }
 0x201   :  { %v1319_v33 = vpop.xlane.xlu2 %1318 }
 0x202   :  { %v1365_v19 = vsub.f32 %v1150_v31, %v1319_v33 }
 0x204   :  { %v1381_v52 = vmul.f32 1.442695, %v1365_v19 }
 0x206   :  { %2255 = vpow2.f32 %v1381_v52 }
 0x209   :  { %v1322_v1 = vpop.xlane.xlu0 %1321 }
 0x20a   :  { %v1366_v59 = vsub.f32 %v1153_v13, %v1322_v1 }
 0x20b   :  { %v1328_v58 = vpop.xlane.xlu1 %1327 }
 0x20c   :  { %v3241_v37 = vpop.eup %2255  ;;  %v1368_v2 = vsub.f32 %v1176_v30, %v1328_v58  ;;  %v1383_v15 = vmul.f32 1.442695, %v1366_v59 }
 0x20d   :  { %v1331_v62 = vpop.xlane.xlu2 %1330  ;;  %v1413_v7 = vsel %vm95_vm0, %v3241_v37, 0.0 }
 0x20e   :  { %v1387_v17 = vmul.f32 1.442695, %v1368_v2  ;;  %2257 = vpow2.f32 %v1383_v15  ;;  %v1369_v41 = vsub.f32 %v1196_v28, %v1331_v62  ;;  %1414 = vadd.xlane.f32.xlu0 %v1413_v7 }
 0x210   :  { %2259 = vpow2.f32 %v1387_v17  ;;  %v1389_v35 = vmul.f32 1.442695, %v1369_v41 }
 0x212   :  { %2261 = vpow2.f32 %v1389_v35 }
 0x214   :  { %v3245_v20 = vpop.eup %2257 }
 0x215   :  { %v1337_v39 = vpop.xlane.xlu2 %1336  ;;  %v1334_v60 = vpop.xlane.xlu0 %1333  ;;  %v1416_v54 = vsel %vm95_vm0, %v3245_v20, 0.0 }
 0x216   :  { %v3249_v26 = vpop.eup %2259  ;;  %v1371_v48 = vsub.f32 %v1219_v51, %v1337_v39  ;;  %1417 = vadd.xlane.f32.xlu1 %v1416_v54  ;;  %v1370_v32 = vsub.f32 %v3198_v61, %v1334_v60 }
 0x217   :  { %v1422_v10 = vsel %vm95_vm0, %v3249_v26, 0.0 }
 0x218   :  { %v1393_v50 = vmul.f32 1.442695, %v1371_v48  ;;  %1423 = vadd.xlane.f32.xlu2 %v1422_v10  ;;  %v3255_v43 = vpop.eup %2261  ;;  %v1391_v40 = vmul.f32 1.442695, %v1370_v32 }
 0x219   :  { %v1425_v18 = vsel %vm95_vm0, %v3255_v43, 0.0 }
 0x21a   :  { %v1340_v38 = vpop.xlane.xlu1 %1339  ;;  %2263 = vpow2.f32 %v1393_v50 }
 0x21b   :  { %v1372_v46 = vsub.f32 %v3203_v53, %v1340_v38 }
 0x21d   :  { %v1395_v22 = vmul.f32 1.442695, %v1372_v46  ;;  %v1325_v12 = vpop.xlane.xlu0 %1324 }
 0x21e   :  { %v1367_v31 = vsub.f32 %v3193_v47, %v1325_v12 }
 0x21f   :  { %2265 = vpow2.f32 %v1395_v22 }
 0x220   :  { %v3259_v23 = vpop.eup %2263  ;;  %2267 = vpow2.f32 %v1391_v40  ;;  %1426 = vadd.xlane.f32.xlu2 %v1425_v18  ;;  %v1385_v13 = vmul.f32 1.442695, %v1367_v31 }
 0x221   :  { %v1431_v9 = vsel %vm95_vm0, %v3259_v23, 0.0 }
 0x222   :  { %1432 = vadd.xlane.f32.xlu0 %v1431_v9  ;;  %2269 = vpow2.f32 %v1385_v13 }
 0x225   :  { %v3264_v25 = vpop.eup %2265  ;;  %v1346_v30 = vpop.xlane.xlu2 %1345 }
 0x226   :  { %v3266_v27 = vpop.eup %2267  ;;  %v1374_v28 = vsub.f32 %v3211_v49, %v1346_v30  ;;  %v1434_v42 = vsel %vm95_vm0, %v3264_v25, 0.0 }
 0x227   :  { %1435 = vadd.xlane.f32.xlu1 %v1434_v42  ;;  %v1428_v47 = vsel %vm95_vm0, %v3266_v27, 0.0 }
 0x228   :  { %v1399_v51 = vmul.f32 1.442695, %v1374_v28  ;;  %v3273_v61 = vpop.eup %2269 }
 0x229   :  { %v1419_v8 = vsel %vm95_vm0, %v3273_v61, 0.0 }
 0x22a   :  { %2271 = vpow2.f32 %v1399_v51  ;;  %1429 = vadd.xlane.f32.xlu0 %v1428_v47 }
 0x22f   :  { %v1355_v0 = vpop.xlane.xlu0 %1354  ;;  %1420 = vadd.xlane.f32.xlu1 %v1419_v8 }
 0x230   :  { %v3277_v53 = vpop.eup %2271  ;;  %v1377_v56 = vsub.f32 %v3217_v45, %v1355_v0 }
 0x231   :  { %v1440_v34 = vsel %vm95_vm0, %v3277_v53, 0.0 }
 0x232   :  { %v1405_v49 = vmul.f32 1.442695, %v1377_v56  ;;  %1441 = vadd.xlane.f32.xlu0 %v1440_v34 }
 0x234   :  { %2273 = vpow2.f32 %v1405_v49 }
 0x237   :  { %v1352_v36 = vpop.xlane.xlu0 %1351 }
 0x238   :  { %v1376_v55 = vsub.f32 %v3221_v3, %v1352_v36 }
 0x23a   :  { %v3283_v57 = vpop.eup %2273  ;;  %v1361_v44 = vpop.xlane.xlu1 %1360  ;;  %v1403_v6 = vmul.f32 1.442695, %v1376_v55 }
 0x23b   :  { %v1379_v4 = vsub.f32 %v3225_v5, %v1361_v44  ;;  %v1449_v16 = vsel %vm95_vm0, %v3283_v57, 0.0 }
 0x23c   :  { %2275 = vpow2.f32 %v1403_v6  ;;  %1450 = vadd.xlane.f32.xlu1 %v1449_v16 }
 0x23d   :  { %v1409_v45 = vmul.f32 1.442695, %v1379_v4 }
 0x23f   :  { %2277 = vpow2.f32 %v1409_v45 }
 0x242   :  { %v3288_v24 = vpop.eup %2275  ;;  %v1358_v33 = vpop.xlane.xlu1 %1357 }
 0x243   :  { %v1364_v19 = vpop.xlane.xlu2 %1363  ;;  %v1378_v52 = vsub.f32 %v3229_v14, %v1358_v33  ;;  %v1446_v1 = vsel %vm95_vm0, %v3288_v24, 0.0 }
 0x244   :  { %v1380_v3 = vsub.f32 %v3233_v63, %v1364_v19  ;;  %1447 = vadd.xlane.f32.xlu1 %v1446_v1 }
 0x245   :  { %v3294_v5 = vpop.eup %2277  ;;  %v1407_v59 = vmul.f32 1.442695, %v1378_v52 }
 0x246   :  { %v1411_v58 = vmul.f32 1.442695, %v1380_v3  ;;  %v1455_v2 = vsel %vm95_vm0, %v3294_v5, 0.0 }
 0x247   :  { %2279 = vpow2.f32 %v1407_v59  ;;  %1456 = vadd.xlane.f32.xlu2 %v1455_v2 }
 0x248   :  { %2281 = vpow2.f32 %v1411_v58 }
 0x24a   :  { %v1343_v15 = vpop.xlane.xlu1 %1342 }
 0x24b   :  { %v1349_v62 = vpop.xlane.xlu2 %1348  ;;  %v1373_v14 = vsub.f32 %v3207_v21, %v1343_v15 }
 0x24c   :  { %v1375_v63 = vsub.f32 %v3215_v29, %v1349_v62 }
 0x24d   :  { %v3300_v7 = vpop.eup %2279  ;;  %v1397_v17 = vmul.f32 1.442695, %v1373_v14 }
 0x24e   :  { %v1401_v41 = vmul.f32 1.442695, %v1375_v63  ;;  %v3302_v35 = vpop.eup %2281  ;;  %v1452_v39 = vsel %vm95_vm0, %v3300_v7, 0.0 }
 0x24f   :  { %2283 = vpow2.f32 %v1397_v17  ;;  %1453 = vadd.xlane.f32.xlu2 %v1452_v39  ;;  %v1458_v60 = vsel %vm95_vm0, %v3302_v35, 0.0 }
 0x250   :  { %2285 = vpow2.f32 %v1401_v41  ;;  %1459 = vadd.xlane.f32.xlu0 %v1458_v60 }
 0x255   :  { %v3308_v54 = vpop.eup %2283 }
 0x256   :  { %v3310_v21 = vpop.eup %2285  ;;  %v1437_v29 = vsel %vm95_vm0, %v3308_v54, 0.0 }
 0x257   :  { %1438 = vadd.xlane.f32.xlu2 %v1437_v29  ;;  %v1443_v48 = vsel %vm95_vm0, %v3310_v21, 0.0 }
 0x258   :  { %1444 = vadd.xlane.f32.xlu0 %v1443_v48 }
 0x281   :  { %v1415_v10 = vpop.xlane.xlu0 %1414 }
 0x282   :  { %2287 = vrcp.f32 %v1415_v10 }
 0x288   :  { %v2288_v50 = vpop.eup %2287 }
 0x289   :  { %v1477_v32 = vmul.f32 %v2288_v50, %v1415_v10  ;;  %v1418_v38 = vpop.xlane.xlu1 %1417 }
 0x28a   :  { %2289 = vrcp.f32 %v1418_v38 }
 0x28b   :  { %v1493_v46 = vsub.f32 2.0, %v1477_v32  ;;  %v1424_v40 = vpop.xlane.xlu2 %1423 }
 0x28c   :  { %2291 = vrcp.f32 %v1424_v40 }
 0x28d   :  { %v1509_v22 = vmul.f32 %v2288_v50, %v1493_v46 }
 0x28f   :  { %v1525_v12 = vmul.f32 %v3241_v37, %v1509_v22 }
 0x290   :  { %v2290_v18 = vpop.eup %2289 }
 0x291   :  { %v1478_v31 = vmul.f32 %v2290_v18, %v1418_v38  ;;  %v1541_v9 = vsel %vm95_vm0, %v1525_v12, 0.0 }
 0x292   :  { %v2292_v13 = vpop.eup %2291  ;;  %1542 = vadd.xlane.f32.xlu1 %v1541_v9 }
 0x293   :  { %v1494_v30 = vsub.f32 2.0, %v1478_v31  ;;  %v1480_v28 = vmul.f32 %v2292_v13, %v1424_v40  ;;  %v1427_v42 = vpop.xlane.xlu2 %1426 }
 0x294   :  { %2293 = vrcp.f32 %v1427_v42 }
 0x295   :  { %v1510_v51 = vmul.f32 %v2290_v18, %v1494_v30  ;;  %v1496_v47 = vsub.f32 2.0, %v1480_v28  ;;  %v1433_v8 = vpop.xlane.xlu0 %1432 }
 0x296   :  { %2295 = vrcp.f32 %v1433_v8 }
 0x297   :  { %v1512_v0 = vmul.f32 %v2292_v13, %v1496_v47  ;;  %v1526_v56 = vmul.f32 %v3245_v20, %v1510_v51 }
 0x299   :  { %v1544_v34 = vsel %vm95_vm0, %v1526_v56, 0.0  ;;  %v1528_v37 = vmul.f32 %v3249_v26, %v1512_v0 }
 0x29a   :  { %v2294_v49 = vpop.eup %2293  ;;  %v1436_v36 = vpop.xlane.xlu1 %1435  ;;  %1545 = vadd.xlane.f32.xlu2 %v1544_v34 }
 0x29b   :  { %v1481_v55 = vmul.f32 %v2294_v49, %v1427_v42  ;;  %2297 = vrcp.f32 %v1436_v36  ;;  %v1550_v44 = vsel %vm95_vm0, %v1528_v37, 0.0 }
 0x29c   :  { %1551 = vadd.xlane.f32.xlu0 %v1550_v44  ;;  %v2296_v16 = vpop.eup %2295 }
 0x29d   :  { %v1430_v6 = vpop.xlane.xlu0 %1429  ;;  %v1497_v4 = vsub.f32 2.0, %v1481_v55  ;;  %v1483_v20 = vmul.f32 %v2296_v16, %v1433_v8 }
 0x29e   :  { %2299 = vrcp.f32 %v1430_v6 }
 0x29f   :  { %v1513_v33 = vmul.f32 %v2294_v49, %v1497_v4  ;;  %v1499_v26 = vsub.f32 2.0, %v1483_v20 }
 0x2a1   :  { %v2298_v45 = vpop.eup %2297  ;;  %v1529_v59 = vmul.f32 %v3255_v43, %v1513_v33  ;;  %v1515_v14 = vmul.f32 %v2296_v16, %v1499_v26 }
 0x2a2   :  { %v1484_v19 = vmul.f32 %v2298_v45, %v1436_v36  ;;  %v1421_v52 = vpop.xlane.xlu1 %1420 }
 0x2a3   :  { %2301 = vrcp.f32 %v1421_v52  ;;  %v1553_v2 = vsel %vm95_vm0, %v1529_v59, 0.0  ;;  %v1531_v48 = vmul.f32 %v3259_v23, %v1515_v14 }
 0x2a4   :  { %v2300_v3 = vpop.eup %2299  ;;  %v1500_v1 = vsub.f32 2.0, %v1484_v19  ;;  %1554 = vadd.xlane.f32.xlu0 %v1553_v2 }
 0x2a5   :  { %v1442_v58 = vpop.xlane.xlu0 %1441  ;;  %v1482_v62 = vmul.f32 %v2300_v3, %v1430_v6  ;;  %v1559_v43 = vsel %vm95_vm0, %v1531_v48, 0.0 }
 0x2a6   :  { %2303 = vrcp.f32 %v1442_v58  ;;  %v1516_v63 = vmul.f32 %v2298_v45, %v1500_v1  ;;  %1560 = vadd.xlane.f32.xlu1 %v1559_v43  ;;  %v1611_v43 = vld [vmem:[%s3638_s12] sm:$0xff] }
 0x2a7   :  { %v1498_v39 = vsub.f32 2.0, %v1482_v62 }
 0x2a8   :  { %v1532_v10 = vmul.f32 %v3264_v25, %v1516_v63 }
 0x2a9   :  { %v2302_v15 = vpop.eup %2301  ;;  %v1514_v38 = vmul.f32 %v2300_v3, %v1498_v39 }
 0x2aa   :  { %v1479_v17 = vmul.f32 %v2302_v15, %v1421_v52  ;;  %v1562_v32 = vsel %vm95_vm0, %v1532_v10, 0.0 }
 0x2ab   :  { %1563 = vadd.xlane.f32.xlu2 %v1562_v32  ;;  %v1530_v18 = vmul.f32 %v3266_v27, %v1514_v38  ;;  %v1610_v32 = vld [vmem:[%s3637_s11 + $0x8] sm:$0xff] }
 0x2ac   :  { %v2304_v41 = vpop.eup %2303  ;;  %v1495_v60 = vsub.f32 2.0, %v1479_v17  ;;  %v1612_v38 = vld [vmem:[%s3638_s12 + $0x8] sm:$0xff] }
 0x2ad   :  { %v1486_v29 = vmul.f32 %v2304_v41, %v1442_v58  ;;  %v1556_v25 = vsel %vm95_vm0, %v1530_v18, 0.0 }
 0x2ae   :  { %v1511_v46 = vmul.f32 %v2302_v15, %v1495_v60  ;;  %1557 = vadd.xlane.f32.xlu1 %v1556_v25 }
 0x2af   :  { %v1451_v50 = vpop.xlane.xlu1 %1450  ;;  %v1502_v40 = vsub.f32 2.0, %v1486_v29 }
 0x2b0   :  { %2305 = vrcp.f32 %v1451_v50  ;;  %v1527_v31 = vmul.f32 %v3273_v61, %v1511_v46 }
 0x2b1   :  { %v1518_v12 = vmul.f32 %v2304_v41, %v1502_v40 }
 0x2b2   :  { %v1547_v13 = vsel %vm95_vm0, %v1527_v31, 0.0  ;;  %v2336_v31 = vld [vmem:[#allocation2] sm:$0xff] }
 0x2b3   :  { %1548 = vadd.xlane.f32.xlu2 %v1547_v13  ;;  %v1534_v42 = vmul.f32 %v3277_v53, %v1518_v12  ;;  %v3369_v13 = vld [vmem:[%s3635_s9] sm:$0xff] }
 0x2b5   :  { %v1568_v61 = vsel %vm95_vm0, %v1534_v42, 0.0 }
 0x2b6   :  { %v2306_v22 = vpop.eup %2305  ;;  %1569 = vadd.xlane.f32.xlu1 %v1568_v61 }
 0x2b7   :  { %v1489_v23 = vmul.f32 %v2306_v22, %v1451_v50  ;;  %v1448_v9 = vpop.xlane.xlu1 %1447  ;;  %v1607_v50 = vld [vmem:[%s3636_s10] sm:$0xff] }
 0x2b8   :  { %2307 = vrcp.f32 %v1448_v9 }
 0x2b9   :  { %v1505_v30 = vsub.f32 2.0, %v1489_v23 }
 0x2ba   :  { %v1457_v28 = vpop.xlane.xlu2 %1456 }
 0x2bb   :  { %2309 = vrcp.f32 %v1457_v28  ;;  %v1521_v51 = vmul.f32 %v2306_v22, %v1505_v30  ;;  %v2335_v22 = vld [vmem:[#allocation2 + $0x8] sm:$0xff] }
 0x2bc   :  { %v3376_v30 = vld [vmem:[%s3635_s9 + $0x8] sm:$0xff]  ;;  %s2408_s9 = smov [#allocation5]  }
 0x2bd   :  { %v1537_v47 = vmul.f32 %v3283_v57, %v1521_v51  ;;  %v2338_v51 = vld [vmem:[#allocation2 + $0x38] sm:$0xff]  ;;  %s2149_s16 = sshll.u32 %s2408_s9, 4  ;;  %s2150_s16 = int_to_ptr.vmem [resolvable:$true] %s2149_s16 }
 0x2be   :  { %v2308_v27 = vpop.eup %2307 }
 0x2bf   :  { %v1488_v8 = vmul.f32 %v2308_v27, %v1448_v9  ;;  %v1577_v0 = vsel %vm95_vm0, %v1537_v47, 0.0  ;;  %v2337_v9 = vld [vmem:[#allocation2 + $0x18] sm:$0xff] }
 0x2c0   :  { %1578 = vadd.xlane.f32.xlu2 %v1577_v0 }
 0x2c1   :  { %v2310_v56 = vpop.eup %2309  ;;  %v1504_v34 = vsub.f32 2.0, %v1488_v8 }
 0x2c2   :  { %v1491_v37 = vmul.f32 %v2310_v56, %v1457_v28  ;;  %v1454_v49 = vpop.xlane.xlu2 %1453 }
 0x2c3   :  { %2311 = vrcp.f32 %v1454_v49  ;;  %v1520_v36 = vmul.f32 %v2308_v27, %v1504_v34  ;;  %v1460_v55 = vpop.xlane.xlu0 %1459  ;;  %v2339_v27 = vld [vmem:[#allocation2 + $0x30] sm:$0xff]  ;;  %v2340_v34 = vld [vmem:[#allocation2 + $0x28] sm:$0xff] }
 0x2c4   :  { %v1507_v53 = vsub.f32 2.0, %v1491_v37  ;;  %2313 = vrcp.f32 %v1460_v55 }
 0x2c5   :  { %v1536_v44 = vmul.f32 %v3288_v24, %v1520_v36 }
 0x2c6   :  { %v1523_v57 = vmul.f32 %v2310_v56, %v1507_v53 }
 0x2c7   :  { %v1574_v6 = vsel %vm95_vm0, %v1536_v44, 0.0 }
 0x2c8   :  { %v1539_v4 = vmul.f32 %v3294_v5, %v1523_v57  ;;  %1575 = vadd.xlane.f32.xlu2 %v1574_v6  ;;  %v2343_v6 = vld [vmem:[#allocation2 + $0x48] sm:$0xff] }
 0x2c9   :  { %v2312_v16 = vpop.eup %2311 }
 0x2ca   :  { %v2314_v45 = vpop.eup %2313  ;;  %v1490_v33 = vmul.f32 %v2312_v16, %v1454_v49  ;;  %v1439_v20 = vpop.xlane.xlu2 %1438  ;;  %v1583_v19 = vsel %vm95_vm0, %v1539_v4, 0.0  ;;  %v2341_v49 = vld [vmem:[#allocation2 + $0x10] sm:$0xff] }
 0x2cb   :  { %v1492_v52 = vmul.f32 %v2314_v45, %v1460_v55  ;;  %2315 = vrcp.f32 %v1439_v20  ;;  %1584 = vadd.xlane.f32.xlu0 %v1583_v19  ;;  %v1445_v3 = vpop.xlane.xlu0 %1444  ;;  %v2342_v55 = vld [vmem:[#allocation2 + $0x20] sm:$0xff] }
 0x2cc   :  { %v1506_v26 = vsub.f32 2.0, %v1490_v33  ;;  %2317 = vrcp.f32 %v1445_v3 }
 0x2cd   :  { %v1508_v1 = vsub.f32 2.0, %v1492_v52  ;;  %v2345_v52 = vld [vmem:[#allocation2 + $0x68] sm:$0xff] }
 0x2ce   :  { %v1522_v24 = vmul.f32 %v2312_v16, %v1506_v26 }
 0x2cf   :  { %v1524_v59 = vmul.f32 %v2314_v45, %v1508_v1  ;;  %v2344_v45 = vld [vmem:[#allocation2 + $0x58] sm:$0xff] }
 0x2d0   :  { %v1538_v58 = vmul.f32 %v3300_v7, %v1522_v24  ;;  %v2346_v1 = vld [vmem:[#allocation2 + $0x78] sm:$0xff] }
 0x2d1   :  { %v2316_v2 = vpop.eup %2315  ;;  %v1540_v5 = vmul.f32 %v3302_v35, %v1524_v59  ;;  %v2347_v59 = vld [vmem:[#allocation2 + $0x60] sm:$0xff] }
 0x2d2   :  { %v2318_v15 = vpop.eup %2317  ;;  %v1485_v62 = vmul.f32 %v2316_v2, %v1439_v20  ;;  %v1580_v14 = vsel %vm95_vm0, %v1538_v58, 0.0 }
 0x2d3   :  { %v1487_v63 = vmul.f32 %v2318_v15, %v1445_v3  ;;  %1581 = vadd.xlane.f32.xlu0 %v1580_v14  ;;  %v1586_v17 = vsel %vm95_vm0, %v1540_v5, 0.0 }
 0x2d4   :  { %v1501_v41 = vsub.f32 2.0, %v1485_v62  ;;  %1587 = vadd.xlane.f32.xlu1 %v1586_v17  ;;  %v2349_v62 = vld [vmem:[#allocation2 + $0x40] sm:$0xff]  ;;  %v2350_v17 = vld [vmem:[#allocation2 + $0x50] sm:$0xff] }
 0x2d5   :  { %v1503_v39 = vsub.f32 2.0, %v1487_v63 }
 0x2d6   :  { %v1517_v60 = vmul.f32 %v2316_v2, %v1501_v41  ;;  %v2348_v2 = vld [vmem:[#allocation2 + $0x70] sm:$0xff] }
 0x2d7   :  { %v1519_v29 = vmul.f32 %v2318_v15, %v1503_v39 }
 0x2d8   :  { %v1533_v48 = vmul.f32 %v3308_v54, %v1517_v60  ;;  %v1608_v54 = vld [vmem:[%s3636_s10 + $0x8] sm:$0xff] }
 0x2d9   :  { %v1535_v7 = vmul.f32 %v3310_v21, %v1519_v29  ;;  %v1609_v21 = vld [vmem:[%s3637_s11] sm:$0xff] }
 0x2da   :  { %v1565_v10 = vsel %vm95_vm0, %v1533_v48, 0.0 }
 0x2db   :  { %1566 = vadd.xlane.f32.xlu0 %v1565_v10  ;;  %v1571_v35 = vsel %vm95_vm0, %v1535_v7, 0.0 }
 0x2dc   :  { %1572 = vadd.xlane.f32.xlu1 %v1571_v35 }
 0x2e0   :  { %1615 = vperm.xlu2 %2220, %v1607_v50  }
 0x2e8   :  { %2105 = vperm.xlu2 %2220, %v1611_v43  }
 0x2ef   :  { %1620 = vperm.xlu0 %2218, %v1608_v54  }
 0x2f5   :  { %2079 = vperm.xlu1 %2219, %v1609_v21  }
 0x2f7   :  { %2084 = vperm.xlu0 %2218, %v1610_v32  }
 0x2fd   :  { %2110 = vperm.xlu1 %2219, %v1612_v38  }
 0x305   :  { %v1543_v46 = vpop.xlane.xlu1 %1542 }
 0x306   :  { %v1589_v23 = vmul.f32 %v2336_v31, %v1543_v46 }
 0x30d   :  { %v1546_v40 = vpop.xlane.xlu2 %1545 }
 0x30e   :  { %v1590_v12 = vmul.f32 %v2335_v22, %v1546_v40 }
 0x30f   :  { %v1552_v18 = vpop.xlane.xlu0 %1551 }
 0x310   :  { %v1592_v25 = vmul.f32 %v2337_v9, %v1552_v18  ;;  %1643 = vmatpush.msra.mxu0 %v1590_v12 }
 0x312   :  { %1666 = vmatpush.msra.mxu1 %v1592_v25  ;;  %1644 = vmatpush.msra.mxu0 %v1589_v23 }
 0x313   :  { %2196 = vmatmul.msk.f32.vlgmr.msra.gmra.mxu0 %vm95_vm0, %v3369_v13 }
 0x317   :  { %v1555_v8 = vpop.xlane.xlu0 %1554 }
 0x318   :  { %v1593_v53 = vmul.f32 %v2342_v55, %v1555_v8 }
 0x319   :  { %v1561_v28 = vpop.xlane.xlu1 %1560 }
 0x31a   :  { %v1595_v61 = vmul.f32 %v2339_v27, %v1561_v28 }
 0x31b   :  { %2197 = vmatmul.msk.f32.gmra.mxu0 %vm95_vm0, %v3376_v30 }
 0x31e   :  { %v1564_v42 = vpop.xlane.xlu2 %1563 }
 0x31f   :  { %v1596_v47 = vmul.f32 %v2338_v51, %v1564_v42 }
 0x321   :  { %1712 = vmatpush.msra.mxu3 %v1596_v47  ;;  %v1558_v0 = vpop.xlane.xlu1 %1557 }
 0x322   :  { %v1594_v37 = vmul.f32 %v2340_v34, %v1558_v0 }
 0x323   :  { %1713 = vmatpush.msra.mxu3 %v1595_v61 }
 0x324   :  { %2202 = vmatmul.msk.f32.vlgmr.msra.gmra.mxu3 %vm95_vm0, %v3369_v13  ;;  %1689 = vmatpush.msra.mxu2 %v1594_v37 }
 0x326   :  { %v1549_v56 = vpop.xlane.xlu2 %1548  ;;  %1690 = vmatpush.msra.mxu2 %v1593_v53 }
 0x327   :  { %v1591_v36 = vmul.f32 %v2341_v49, %v1549_v56  ;;  %2200 = vmatmul.msk.f32.vlgmr.msra.gmra.mxu2 %vm95_vm0, %v3369_v13 }
 0x329   :  { %1667 = vmatpush.msra.mxu1 %v1591_v36  ;;  %v1570_v44 = vpop.xlane.xlu1 %1569 }
 0x32a   :  { %2198 = vmatmul.msk.f32.vlgmr.msra.gmra.mxu1 %vm95_vm0, %v3369_v13  ;;  %v1598_v4 = vmul.f32 %v2343_v6, %v1570_v44 }
 0x32c   :  { %2203 = vmatmul.msk.f32.gmra.mxu3 %vm95_vm0, %v3376_v30  ;;  %1735 = vmatpush.msrb.mxu0 %v1598_v4 }
 0x32f   :  { %2201 = vmatmul.msk.f32.gmra.mxu2 %vm95_vm0, %v3376_v30 }
 0x332   :  { %2199 = vmatmul.msk.f32.gmra.mxu1 %vm95_vm0, %v3376_v30 }
 0x333   :  { %v1579_v57 = vpop.xlane.xlu2 %1578 }
 0x334   :  { %v1601_v58 = vmul.f32 %v2347_v59, %v1579_v57 }
 0x33b   :  { %v1576_v16 = vpop.xlane.xlu2 %1575 }
 0x33c   :  { %v1600_v33 = vmul.f32 %v2344_v45, %v1576_v16 }
 0x33e   :  { %v1585_v20 = vpop.xlane.xlu0 %1584  ;;  %1758 = vmatpush.msrb.mxu1 %v1600_v33 }
 0x33f   :  { %v1603_v5 = vmul.f32 %v2348_v2, %v1585_v20 }
 0x343   :  { %v3408_v60 = vpop.permute.xlu2 %1615 }
 0x346   :  { %v1582_v19 = vpop.xlane.xlu0 %1581 }
 0x347   :  { %v1602_v3 = vmul.f32 %v2345_v52, %v1582_v19  ;;  %v1588_v26 = vpop.xlane.xlu1 %1587 }
 0x348   :  { %v1604_v24 = vmul.f32 %v2346_v1, %v1588_v26 }
 0x349   :  { %1781 = vmatpush.msrb.mxu2 %v1602_v3 }
 0x34a   :  { %1804 = vmatpush.msrb.mxu3 %v1604_v24 }
 0x34b   :  { %1782 = vmatpush.msrb.mxu2 %v1601_v58 }
 0x34c   :  { %1805 = vmatpush.msrb.mxu3 %v1603_v5  ;;  %2208 = vmatmul.msk.f32.vlgmr.msrb.gmra.mxu2 %vm95_vm0, %v3369_v13 }
 0x34d   :  { %2210 = vmatmul.msk.f32.vlgmr.msrb.gmra.mxu3 %vm95_vm0, %v3369_v13 }
 0x34e   :  { %v1567_v15 = vpop.xlane.xlu0 %1566 }
 0x34f   :  { %v1597_v14 = vmul.f32 %v2349_v62, %v1567_v15  ;;  %v1573_v63 = vpop.xlane.xlu1 %1572 }
 0x350   :  { %v1599_v41 = vmul.f32 %v2350_v17, %v1573_v63 }
 0x351   :  { %1736 = vmatpush.msrb.mxu0 %v1597_v14 }
 0x352   :  { %2204 = vmatmul.msk.f32.vlgmr.msrb.gmra.mxu0 %vm95_vm0, %v3369_v13  ;;  %1759 = vmatpush.msrb.mxu1 %v1599_v41 }
 0x353   :  { %2206 = vmatmul.msk.f32.vlgmr.msrb.gmra.mxu1 %vm95_vm0, %v3369_v13 }
 0x354   :  { %2209 = vmatmul.msk.f32.gmra.mxu2 %vm95_vm0, %v3376_v30 }
 0x355   :  { %2211 = vmatmul.msk.f32.gmra.mxu3 %vm95_vm0, %v3376_v30 }
 0x35a   :  { %2205 = vmatmul.msk.f32.gmra.mxu0 %vm95_vm0, %v3376_v30 }
 0x35b   :  { %2207 = vmatmul.msk.f32.gmra.mxu1 %vm95_vm0, %v3376_v30 }
 0x361   :  { %v3410_v29 = vpop.permute.xlu0 %1620 }
 0x390   :  { %v1646_v39 = vpop.f32.mrf.mxu0 }
 0x391   :  { %v1647_v7 = vadd.f32 %v1646_v39, %v3408_v60 }
 0x398   :  { %v1649_v48 = vpop.f32.mrf.mxu0 }
 0x399   :  { %v1650_v10 = vadd.f32 %v1649_v48, %v3410_v29 }
 0x39b   :  { %v1813_v35 = vadd.f32 %v1650_v10, %v1647_v7 }
 0x39d   :  { %v1814_v50 = vrot.slane %v1813_v35, 4 }
 0x39f   :  { %v1815_v43 = vadd.f32 %v1814_v50, %v1813_v35  ;;  %v3440_v35 = vpop.permute.xlu1 %2079 }
 0x3a1   :  { %v1816_v54 = vrot.slane %v1815_v43, 2 }
 0x3a3   :  { %v1817_v21 = vadd.f32 %v1816_v54, %v1815_v43 }
 0x3a5   :  { %v1818_v32 = vrot.slane %v1817_v21, 1 }
 0x3a7   :  { %v1819_v38 = vadd.f32 %v1818_v32, %v1817_v21  ;;  %v1669_v23 = vpop.f32.mrf.mxu1  ;;  %v1715_v9 = vpop.f32.mrf.mxu3 }
 0x3a8   :  { %v1670_v47 = vadd.f32 %v1669_v23, %v3408_v60  ;;  %v1716_v0 = vadd.f32 %v1715_v9, %v3408_v60 }
 0x3a9   :  { %v1869_v46 = vmul.f32 %v1819_v38, %v2589_v11 }
 0x3aa   :  { %v1692_v51 = vpop.f32.mrf.mxu2 }
 0x3ab   :  { %v3415_v40 = vsub.f32 %v1647_v7, %v1869_v46  ;;  %v3417_v22 = vsub.f32 %v1650_v10, %v1869_v46  ;;  %v1693_v45 = vadd.f32 %v1692_v51, %v3408_v60 }
 0x3ad   :  { %v1893_v12 = vmul.f32 %v3415_v40, %v3415_v40  ;;  %v1894_v18 = vmul.f32 %v3417_v22, %v3417_v22 }
 0x3af   :  { %v1909_v31 = vadd.f32 %v1894_v18, %v1893_v12  ;;  %v1672_v42 = vpop.f32.mrf.mxu1  ;;  %v1718_v61 = vpop.f32.mrf.mxu3 }
 0x3b0   :  { %v1673_v27 = vadd.f32 %v1672_v42, %v3410_v29  ;;  %v1719_v56 = vadd.f32 %v1718_v61, %v3410_v29 }
 0x3b1   :  { %v1910_v25 = vrot.slane %v1909_v31, 4 }
 0x3b2   :  { %v1820_v34 = vadd.f32 %v1673_v27, %v1670_v47  ;;  %v1834_v49 = vadd.f32 %v1719_v56, %v1716_v0  ;;  %v1695_v4 = vpop.f32.mrf.mxu2 }
 0x3b3   :  { %v1911_v13 = vadd.f32 %v1910_v25, %v1909_v31  ;;  %v1696_v33 = vadd.f32 %v1695_v4, %v3410_v29 }
 0x3b4   :  { %v1821_v36 = vrot.slane %v1820_v34, 4  ;;  %v1835_v53 = vrot.slane %v1834_v49, 4 }
 0x3b5   :  { %v1912_v30 = vrot.slane %v1911_v13, 2  ;;  %v1827_v52 = vadd.f32 %v1696_v33, %v1693_v45 }
 0x3b6   :  { %v1822_v44 = vadd.f32 %v1821_v36, %v1820_v34  ;;  %v1836_v6 = vadd.f32 %v1835_v53, %v1834_v49 }
 0x3b7   :  { %v1913_v28 = vadd.f32 %v1912_v30, %v1911_v13  ;;  %v1828_v1 = vrot.slane %v1827_v52, 4 }
 0x3b8   :  { %v1823_v16 = vrot.slane %v1822_v44, 2  ;;  %v1837_v20 = vrot.slane %v1836_v6, 2 }
 0x3b9   :  { %v1914_v8 = vrot.slane %v1913_v28, 1  ;;  %v1829_v58 = vadd.f32 %v1828_v1, %v1827_v52 }
 0x3ba   :  { %v1824_v19 = vadd.f32 %v1823_v16, %v1822_v44  ;;  %v1838_v3 = vadd.f32 %v1837_v20, %v1836_v6  ;;  %v3465_v6 = vpop.permute.xlu2 %2105 }
 0x3bb   :  { %v1915_v37 = vadd.f32 %v1914_v8, %v1913_v28  ;;  %v1830_v14 = vrot.slane %v1829_v58, 2 }
 0x3bc   :  { %v1825_v26 = vrot.slane %v1824_v19, 1  ;;  %v1839_v24 = vrot.slane %v1838_v3, 1 }
 0x3bd   :  { %v1965_v55 = vmul.f32 %v1915_v37, %v2589_v11  ;;  %v1831_v48 = vadd.f32 %v1830_v14, %v1829_v58  ;;  %v3457_v37 = vpop.permute.xlu0 %2084 }
 0x3be   :  { %v1826_v59 = vadd.f32 %v1825_v26, %v1824_v19  ;;  %v1840_v5 = vadd.f32 %v1839_v24, %v1838_v3 }
 0x3bf   :  { %v1973_v57 = vadd.f32 1e-05, %v1965_v55  ;;  %v1832_v21 = vrot.slane %v1831_v48, 1 }
 0x3c0   :  { %v1870_v62 = vmul.f32 %v1826_v59, %v2589_v11  ;;  %v1872_v63 = vmul.f32 %v1840_v5, %v2589_v11 }
 0x3c1   :  { %2319 = vrsqrt.f32 %v1973_v57  ;;  %v1833_v18 = vadd.f32 %v1832_v21, %v1831_v48  ;;  %vm1987_vm5 = vweird.f32 %v1973_v57 }
 0x3c2   :  { %v3432_v41 = vsub.f32 %v1670_v47, %v1870_v62  ;;  %v3434_v39 = vsub.f32 %v1673_v27, %v1870_v62  ;;  %v3436_v7 = vsub.f32 %v1716_v0, %v1872_v63  ;;  %v3438_v10 = vsub.f32 %v1719_v56, %v1872_v63 }
 0x3c3   :  { %v1871_v30 = vmul.f32 %v1833_v18, %v2589_v11 }
 0x3c4   :  { %v1895_v43 = vmul.f32 %v3432_v41, %v3432_v41  ;;  %v1896_v54 = vmul.f32 %v3434_v39, %v3434_v39  ;;  %v1899_v32 = vmul.f32 %v3436_v7, %v3436_v7  ;;  %v1900_v38 = vmul.f32 %v3438_v10, %v3438_v10 }
 0x3c5   :  { %v3451_v61 = vsub.f32 %v1693_v45, %v1871_v30  ;;  %v3453_v8 = vsub.f32 %v1696_v33, %v1871_v30 }
 0x3c6   :  { %v1916_v12 = vadd.f32 %v1896_v54, %v1895_v43  ;;  %v1930_v31 = vadd.f32 %v1900_v38, %v1899_v32 }
 0x3c7   :  { %v2320_v2 = vpop.eup %2319  ;;  %v1897_v36 = vmul.f32 %v3451_v61, %v3451_v61  ;;  %v1898_v55 = vmul.f32 %v3453_v8, %v3453_v8 }
 0x3c8   :  { %v1982_v15 = vmul.f32 %v2320_v2, %v1973_v57  ;;  %vm1988_vm0 = vweird.f32 %v2320_v2  ;;  %v1917_v13 = vrot.slane %v1916_v12, 4  ;;  %v1931_v51 = vrot.slane %v1930_v31, 4 }
 0x3c9   :  { %vm1989_vm6 = vmor %vm1987_vm5, %vm1988_vm0  ;;  %v1923_v4 = vadd.f32 %v1898_v55, %v1897_v36 }
 0x3ca   :  { %v1983_v17 = vmul.f32 %v2320_v2, %v1982_v15  ;;  %v1918_v27 = vadd.f32 %v1917_v13, %v1916_v12  ;;  %v1932_v34 = vadd.f32 %v1931_v51, %v1930_v31 }
 0x3cb   :  { %v1924_v24 = vrot.slane %v1923_v4, 4 }
 0x3cc   :  { %v1984_v50 = vmul.f32 0.5, %v1983_v17  ;;  %v1919_v49 = vrot.slane %v1918_v27, 2  ;;  %v1933_v57 = vrot.slane %v1932_v34, 2 }
 0x3cd   :  { %v1925_v48 = vadd.f32 %v1924_v24, %v1923_v4 }
 0x3ce   :  { %v1985_v46 = vsub.f32 1.5, %v1984_v50  ;;  %v1934_v19 = vadd.f32 %v1933_v57, %v1932_v34 }
 0x3cf   :  { %v1738_v23 = vpop.f32.mrf.mxu0  ;;  %v1784_v9 = vpop.f32.mrf.mxu2 }
 0x3d0   :  { %v1986_v25 = vmul.f32 %v2320_v2, %v1985_v46  ;;  %v1761_v28 = vpop.f32.mrf.mxu1  ;;  %v1807_v42 = vpop.f32.mrf.mxu3  ;;  %v3470_v16 = vadd.f32 %v1738_v23, %v3408_v60  ;;  %v3478_v3 = vadd.f32 %v1784_v9, %v3408_v60  ;;  %v1935_v15 = vrot.slane %v1934_v19, 1 }
 0x3d1   :  { %v3473_v45 = vadd.f32 %v1761_v28, %v3408_v60  ;;  %v3487_v62 = vadd.f32 %v1807_v42, %v3408_v60 }
 0x3d2   :  { %v1990_v47 = vsel %vm1989_vm6, %v2320_v2, %v1986_v25  ;;  %v1936_v54 = vadd.f32 %v1935_v15, %v1934_v19 }
 0x3d3   :  { %v2061_v0 = vmul.f32 %v1990_v47, %v3415_v40  ;;  %v2062_v56 = vmul.f32 %v1990_v47, %v3417_v22  ;;  %v3467_v40 = vpop.permute.xlu1 %2110  ;;  %v1920_v22 = vadd.f32 %v1919_v49, %v1918_v27 }
 0x3d4   :  { %v1968_v12 = vmul.f32 %v1936_v54, %v2589_v11 }
 0x3d5   :  { %v2087_v53 = vmul.f32 %v3440_v35, %v2061_v0  ;;  %v2088_v44 = vmul.f32 %v3457_v37, %v2062_v56  ;;  %v1921_v1 = vrot.slane %v1920_v22, 1 }
 0x3d6   :  { %v3507_v30 = vadd.f32 1e-05, %v1968_v12 }
 0x3d7   :  { %v2113_v33 = vadd.f32 %v3465_v6, %v2087_v53  ;;  %v2114_v20 = vadd.f32 %v3467_v40, %v2088_v44  ;;  %v1741_v52 = vpop.f32.mrf.mxu0  ;;  %v1787_v26 = vpop.f32.mrf.mxu2  ;;  %v1922_v17 = vadd.f32 %v1921_v1, %v1920_v22 }
 0x3d8   :  { %v3481_v59 = vadd.f32 %v1741_v52, %v3410_v29  ;;  %v1764_v58 = vpop.f32.mrf.mxu1  ;;  %v3484_v2 = vadd.f32 %v1787_v26, %v3410_v29  ;;  %v1810_v5 = vpop.f32.mrf.mxu3  ;;  %vm2017_vm8 = vweird.f32 %v3507_v30 }
 0x3d9   :  { %2129 = vst [vmem:[#allocation5] sm:$0xff] %v2113_v33  ;;  %v3490_v14 = vadd.f32 %v1764_v58, %v3410_v29  ;;  %v3493_v63 = vadd.f32 %v1810_v5, %v3410_v29  ;;  %v1966_v32 = vmul.f32 %v1922_v17, %v2589_v11  ;;  %v1926_v29 = vrot.slane %v1925_v48, 2 }
 0x3da   :  { %2130 = vst [vmem:[#allocation5 + $0x8] sm:$0xff] %v2114_v20  ;;  %v1841_v50 = vadd.f32 %v3481_v59, %v3470_v16  ;;  %v1855_v43 = vadd.f32 %v3484_v2, %v3478_v3 }
 0x3db   :  { %v1848_v60 = vadd.f32 %v3490_v14, %v3473_v45  ;;  %v1862_v21 = vadd.f32 %v3493_v63, %v3487_v62  ;;  %v3505_v23 = vadd.f32 1e-05, %v1966_v32  ;;  %v1927_v9 = vadd.f32 %v1926_v29, %v1925_v48 }
 0x3dc   :  { %v1842_v38 = vrot.slane %v1841_v50, 4  ;;  %v1856_v46 = vrot.slane %v1855_v43, 4 }
 0x3dd   :  { %v1849_v18 = vrot.slane %v1848_v60, 4  ;;  %v1863_v31 = vrot.slane %v1862_v21, 4  ;;  %2321 = vrsqrt.f32 %v3505_v23  ;;  %v1928_v51 = vrot.slane %v1927_v9, 1 }
 0x3de   :  { %v1843_v25 = vadd.f32 %v1842_v38, %v1841_v50  ;;  %v1857_v13 = vadd.f32 %v1856_v46, %v1855_v43  ;;  %2323 = vrsqrt.f32 %v3507_v30  ;;  %vm1997_vm7 = vweird.f32 %v3505_v23 }
 0x3df   :  { %v1850_v28 = vadd.f32 %v1849_v18, %v1848_v60  ;;  %v1864_v42 = vadd.f32 %v1863_v31, %v1862_v21  ;;  %v1929_v56 = vadd.f32 %v1928_v51, %v1927_v9 }
 0x3e0   :  { %v1844_v47 = vrot.slane %v1843_v25, 2  ;;  %v1858_v0 = vrot.slane %v1857_v13, 2 }
 0x3e1   :  { %v1851_v27 = vrot.slane %v1850_v28, 2  ;;  %v1865_v49 = vrot.slane %v1864_v42, 2  ;;  %v1967_v53 = vmul.f32 %v1929_v56, %v2589_v11 }
 0x3e2   :  { %v1845_v34 = vadd.f32 %v1844_v47, %v1843_v25  ;;  %v1859_v55 = vadd.f32 %v1858_v0, %v1857_v13 }
 0x3e3   :  { %v1852_v36 = vadd.f32 %v1851_v27, %v1850_v28  ;;  %v1866_v57 = vadd.f32 %v1865_v49, %v1864_v42  ;;  %v2322_v33 = vpop.eup %2321  ;;  %v3512_v20 = vadd.f32 1e-05, %v1967_v53 }
 0x3e4   :  { %v1846_v44 = vrot.slane %v1845_v34, 1  ;;  %v1860_v4 = vrot.slane %v1859_v55, 1  ;;  %v2324_v26 = vpop.eup %2323  ;;  %v1992_v1 = vmul.f32 %v2322_v33, %v3505_v23  ;;  %vm1998_vm9 = vweird.f32 %v2322_v33 }
 0x3e5   :  { %v1853_v22 = vrot.slane %v1852_v36, 1  ;;  %v1867_v52 = vrot.slane %v1866_v57, 1  ;;  %v2012_v5 = vmul.f32 %v2324_v26, %v3507_v30  ;;  %2325 = vrsqrt.f32 %v3512_v20  ;;  %vm1999_vm12 = vmor %vm1997_vm7, %vm1998_vm9 }
 0x3e6   :  { %v1847_v19 = vadd.f32 %v1846_v44, %v1845_v34  ;;  %v1861_v58 = vadd.f32 %v1860_v4, %v1859_v55  ;;  %v1993_v15 = vmul.f32 %v2322_v33, %v1992_v1  ;;  %vm2018_vm10 = vweird.f32 %v2324_v26 }
 0x3e7   :  { %v1854_v24 = vadd.f32 %v1853_v22, %v1852_v36  ;;  %v2013_v43 = vmul.f32 %v2324_v26, %v2012_v5  ;;  %v1868_v54 = vadd.f32 %v1867_v52, %v1866_v57  ;;  %vm2007_vm11 = vweird.f32 %v3512_v20  ;;  %vm2019_vm14 = vmor %vm2017_vm8, %vm2018_vm10 }
 0x3e8   :  { %v1873_v17 = vmul.f32 %v1847_v19, %v2589_v11  ;;  %v1875_v50 = vmul.f32 %v1861_v58, %v2589_v11  ;;  %v1994_v60 = vmul.f32 0.5, %v1993_v15 }
 0x3e9   :  { %v1874_v48 = vmul.f32 %v1854_v24, %v2589_v11  ;;  %v2014_v38 = vmul.f32 0.5, %v2013_v43  ;;  %v1876_v49 = vmul.f32 %v1868_v54, %v2589_v11 }
 0x3ea   :  { %v3523_v21 = vsub.f32 %v3470_v16, %v1873_v17  ;;  %v3526_v32 = vsub.f32 %v3481_v59, %v1873_v17  ;;  %v3535_v12 = vsub.f32 %v3478_v3, %v1875_v50  ;;  %v3538_v18 = vsub.f32 %v3484_v2, %v1875_v50 }
 0x3eb   :  { %v3529_v29 = vsub.f32 %v3473_v45, %v1874_v48  ;;  %v3532_v46 = vsub.f32 %v3490_v14, %v1874_v48  ;;  %v1995_v31 = vsub.f32 1.5, %v1994_v60  ;;  %v2326_v9 = vpop.eup %2325  ;;  %v2015_v25 = vsub.f32 1.5, %v2014_v38 }
 0x3ec   :  { %v1901_v16 = vmul.f32 %v3523_v21, %v3523_v21  ;;  %v1902_v59 = vmul.f32 %v3526_v32, %v3526_v32  ;;  %v1905_v3 = vmul.f32 %v3535_v12, %v3535_v12  ;;  %v1906_v2 = vmul.f32 %v3538_v18, %v3538_v18 }
 0x3ed   :  { %v1903_v45 = vmul.f32 %v3529_v29, %v3529_v29  ;;  %v1904_v14 = vmul.f32 %v3532_v46, %v3532_v46  ;;  %v1996_v13 = vmul.f32 %v2322_v33, %v1995_v31  ;;  %v2002_v28 = vmul.f32 %v2326_v9, %v3512_v20 }
 0x3ee   :  { %v1937_v42 = vadd.f32 %v1902_v59, %v1901_v16  ;;  %v2016_v51 = vmul.f32 %v2324_v26, %v2015_v25  ;;  %vm2008_vm13 = vweird.f32 %v2326_v9  ;;  %v1951_v27 = vadd.f32 %v1906_v2, %v1905_v3 }
 0x3ef   :  { %v1944_v47 = vadd.f32 %v1904_v14, %v1903_v45  ;;  %v2000_v0 = vsel %vm1999_vm12, %v2322_v33, %v1996_v13  ;;  %v2003_v56 = vmul.f32 %v2326_v9, %v2002_v28  ;;  %vm2009_vm15 = vmor %vm2007_vm11, %vm2008_vm13  ;;  %v3577_v54 = vsub.f32 %v3487_v62, %v1876_v49 }
 0x3f0   :  { %v1938_v34 = vrot.slane %v1937_v42, 4  ;;  %v2063_v36 = vmul.f32 %v2000_v0, %v3432_v41  ;;  %v2064_v55 = vmul.f32 %v2000_v0, %v3434_v39  ;;  %v2020_v53 = vsel %vm2019_vm14, %v2324_v26, %v2016_v51 }
 0x3f1   :  { %v1945_v23 = vrot.slane %v1944_v47, 4  ;;  %v2067_v44 = vmul.f32 %v2020_v53, %v3436_v7  ;;  %v2068_v57 = vmul.f32 %v2020_v53, %v3438_v10  ;;  %v2004_v22 = vmul.f32 0.5, %v2003_v56 }
 0x3f2   :  { %v1939_v4 = vadd.f32 %v1938_v34, %v1937_v42  ;;  %v2089_v33 = vmul.f32 %v3440_v35, %v2063_v36  ;;  %v2090_v30 = vmul.f32 %v3457_v37, %v2064_v55  ;;  %v1952_v52 = vrot.slane %v1951_v27, 4 }
 0x3f3   :  { %v1946_v19 = vadd.f32 %v1945_v23, %v1944_v47  ;;  %v2093_v1 = vmul.f32 %v3440_v35, %v2067_v44  ;;  %v2094_v41 = vmul.f32 %v3457_v37, %v2068_v57  ;;  %v2005_v24 = vsub.f32 1.5, %v2004_v22 }
 0x3f4   :  { %v1940_v39 = vrot.slane %v1939_v4, 2  ;;  %v2115_v26 = vadd.f32 %v3465_v6, %v2089_v33  ;;  %v2116_v7 = vadd.f32 %v3467_v40, %v2090_v30  ;;  %v1953_v10 = vadd.f32 %v1952_v52, %v1951_v27 }
 0x3f5   :  { %v1947_v58 = vrot.slane %v1946_v19, 2  ;;  %v2119_v5 = vadd.f32 %v3465_v6, %v2093_v1  ;;  %v2120_v15 = vadd.f32 %v3467_v40, %v2094_v41  ;;  %v2006_v17 = vmul.f32 %v2326_v9, %v2005_v24 }
 0x3f6   :  { %v1941_v48 = vadd.f32 %v1940_v39, %v1939_v4  ;;  %2131 = vst [vmem:[#allocation5 + $0x10] sm:$0xff] %v2115_v26  ;;  %v1954_v43 = vrot.slane %v1953_v10, 2  ;;  %v3580_v60 = vsub.f32 %v3493_v63, %v1876_v49  ;;  %v1907_v14 = vmul.f32 %v3577_v54, %v3577_v54 }
 0x3f7   :  { %v1948_v50 = vadd.f32 %v1947_v58, %v1946_v19  ;;  %2132 = vst [vmem:[#allocation5 + $0x18] sm:$0xff] %v2116_v7  ;;  %v2010_v38 = vsel %vm2009_vm15, %v2326_v9, %v2006_v17 }
 0x3f8   :  { %v1942_v31 = vrot.slane %v1941_v48, 1  ;;  %2135 = vst [vmem:[#allocation5 + $0x30] sm:$0xff] %v2119_v5  ;;  %v2065_v16 = vmul.f32 %v2010_v38, %v3451_v61  ;;  %v2066_v59 = vmul.f32 %v2010_v38, %v3453_v8  ;;  %v1955_v25 = vadd.f32 %v1954_v43, %v1953_v10 }
 0x3f9   :  { %v1949_v45 = vrot.slane %v1948_v50, 1  ;;  %2136 = vst [vmem:[#allocation5 + $0x38] sm:$0xff] %v2120_v15  ;;  %v1908_v62 = vmul.f32 %v3580_v60, %v3580_v60 }
 0x3fa   :  { %v1943_v20 = vadd.f32 %v1942_v31, %v1941_v48  ;;  %v2091_v63 = vmul.f32 %v3440_v35, %v2065_v16  ;;  %v2092_v9 = vmul.f32 %v3457_v37, %v2066_v59  ;;  %v1956_v2 = vrot.slane %v1955_v25, 1 }
 0x3fb   :  { %v1950_v3 = vadd.f32 %v1949_v45, %v1948_v50  ;;  %v1958_v13 = vadd.f32 %v1908_v62, %v1907_v14 }
 0x3fc   :  { %v1969_v61 = vmul.f32 %v1943_v20, %v2589_v11  ;;  %v2117_v8 = vadd.f32 %v3465_v6, %v2091_v63  ;;  %v2118_v28 = vadd.f32 %v3467_v40, %v2092_v9  ;;  %v1957_v51 = vadd.f32 %v1956_v2, %v1955_v25 }
 0x3fd   :  { %v1970_v42 = vmul.f32 %v1950_v3, %v2589_v11  ;;  %v1959_v27 = vrot.slane %v1958_v13, 4 }
 0x3fe   :  { %v1977_v47 = vadd.f32 1e-05, %v1969_v61  ;;  %2133 = vst [vmem:[#allocation5 + $0x20] sm:$0xff] %v2117_v8  ;;  %v1971_v56 = vmul.f32 %v1957_v51, %v2589_v11 }
 0x3ff   :  { %v1978_v0 = vadd.f32 1e-05, %v1970_v42  ;;  %2134 = vst [vmem:[#allocation5 + $0x28] sm:$0xff] %v2118_v28  ;;  %v1960_v34 = vadd.f32 %v1959_v27, %v1958_v13 }
 0x400   :  { %2327 = vrsqrt.f32 %v1977_v47  ;;  %v1979_v49 = vadd.f32 1e-05, %v1971_v56  ;;  %vm2027_vm3 = vweird.f32 %v1977_v47 }
 0x401   :  { %2329 = vrsqrt.f32 %v1978_v0  ;;  %v1961_v36 = vrot.slane %v1960_v34, 2  ;;  %vm2037_vm0 = vweird.f32 %v1978_v0 }
 0x402   :  { %2331 = vrsqrt.f32 %v1979_v49  ;;  %vm2047_vm7 = vweird.f32 %v1979_v49 }
 0x403   :  { %v1962_v55 = vadd.f32 %v1961_v36, %v1960_v34 }
 0x405   :  { %v1963_v23 = vrot.slane %v1962_v55, 1 }
 0x406   :  { %v2328_v53 = vpop.eup %2327 }
 0x407   :  { %v2330_v44 = vpop.eup %2329  ;;  %v2022_v57 = vmul.f32 %v2328_v53, %v1977_v47  ;;  %v1964_v4 = vadd.f32 %v1963_v23, %v1962_v55  ;;  %vm2028_vm1 = vweird.f32 %v2328_v53 }
 0x408   :  { %v2032_v22 = vmul.f32 %v2330_v44, %v1978_v0  ;;  %v2332_v33 = vpop.eup %2331  ;;  %vm2038_vm2 = vweird.f32 %v2330_v44  ;;  %vm2029_vm4 = vmor %vm2027_vm3, %vm2028_vm1 }
 0x409   :  { %v2023_v30 = vmul.f32 %v2328_v53, %v2022_v57  ;;  %v2042_v52 = vmul.f32 %v2332_v33, %v1979_v49  ;;  %v1972_v1 = vmul.f32 %v1964_v4, %v2589_v11  ;;  %vm2048_vm5 = vweird.f32 %v2332_v33  ;;  %vm2039_vm6 = vmor %vm2037_vm0, %vm2038_vm2 }
 0x40a   :  { %v2033_v19 = vmul.f32 %v2330_v44, %v2032_v22  ;;  %vm2049_vm8 = vmor %vm2047_vm7, %vm2048_vm5 }
 0x40b   :  { %v2024_v41 = vmul.f32 0.5, %v2023_v30  ;;  %v2043_v39 = vmul.f32 %v2332_v33, %v2042_v52  ;;  %v1980_v26 = vadd.f32 1e-05, %v1972_v1 }
 0x40c   :  { %v2034_v24 = vmul.f32 0.5, %v2033_v19 }
 0x40d   :  { %v2025_v7 = vsub.f32 1.5, %v2024_v41  ;;  %v2044_v10 = vmul.f32 0.5, %v2043_v39  ;;  %2333 = vrsqrt.f32 %v1980_v26  ;;  %vm2057_vm10 = vweird.f32 %v1980_v26 }
 0x40e   :  { %v2035_v58 = vsub.f32 1.5, %v2034_v24 }
 0x40f   :  { %v2026_v5 = vmul.f32 %v2328_v53, %v2025_v7  ;;  %v2045_v17 = vsub.f32 1.5, %v2044_v10 }
 0x410   :  { %v2036_v15 = vmul.f32 %v2330_v44, %v2035_v58 }
 0x411   :  { %v2030_v48 = vsel %vm2029_vm4, %v2328_v53, %v2026_v5  ;;  %v2046_v38 = vmul.f32 %v2332_v33, %v2045_v17 }
 0x412   :  { %v2069_v11 = vmul.f32 %v2030_v48, %v3523_v21  ;;  %v2070_v50 = vmul.f32 %v2030_v48, %v3526_v32  ;;  %v2040_v43 = vsel %vm2039_vm6, %v2330_v44, %v2036_v15 }
 0x413   :  { %v2071_v31 = vmul.f32 %v2040_v43, %v3529_v29  ;;  %v2072_v16 = vmul.f32 %v2040_v43, %v3532_v46  ;;  %v2334_v59 = vpop.eup %2333  ;;  %v2050_v20 = vsel %vm2049_vm8, %v2332_v33, %v2046_v38 }
 0x414   :  { %v2095_v45 = vmul.f32 %v3440_v35, %v2069_v11  ;;  %v2096_v25 = vmul.f32 %v3457_v37, %v2070_v50  ;;  %v2073_v21 = vmul.f32 %v2050_v20, %v3535_v12  ;;  %v2074_v32 = vmul.f32 %v2050_v20, %v3538_v18 }
 0x415   :  { %v2097_v14 = vmul.f32 %v3440_v35, %v2071_v31  ;;  %v2098_v62 = vmul.f32 %v3457_v37, %v2072_v16  ;;  %v2052_v46 = vmul.f32 %v2334_v59, %v1980_v26  ;;  %vm2058_vm9 = vweird.f32 %v2334_v59 }
 0x416   :  { %v2121_v63 = vadd.f32 %v3465_v6, %v2095_v45  ;;  %v2122_v29 = vadd.f32 %v3467_v40, %v2096_v25  ;;  %v2099_v2 = vmul.f32 %v3440_v35, %v2073_v21  ;;  %v2100_v61 = vmul.f32 %v3457_v37, %v2074_v32  ;;  %vm2059_vm11 = vmor %vm2057_vm10, %vm2058_vm9 }
 0x417   :  { %v2123_v9 = vadd.f32 %v3465_v6, %v2097_v14  ;;  %v2124_v3 = vadd.f32 %v3467_v40, %v2098_v62  ;;  %v2053_v13 = vmul.f32 %v2334_v59, %v2052_v46 }
 0x418   :  { %2137 = vst [vmem:[#allocation5 + $0x40] sm:$0xff] %v2121_v63  ;;  %v2125_v12 = vadd.f32 %v3465_v6, %v2099_v2  ;;  %v2126_v18 = vadd.f32 %v3467_v40, %v2100_v61 }
 0x419   :  { %2138 = vst [vmem:[#allocation5 + $0x48] sm:$0xff] %v2122_v29  ;;  %v2054_v8 = vmul.f32 0.5, %v2053_v13 }
 0x41a   :  { %2139 = vst [vmem:[#allocation5 + $0x50] sm:$0xff] %v2123_v9 }
 0x41b   :  { %2140 = vst [vmem:[#allocation5 + $0x58] sm:$0xff] %v2124_v3  ;;  %v2055_v28 = vsub.f32 1.5, %v2054_v8 }
 0x41c   :  { %2141 = vst [vmem:[#allocation5 + $0x60] sm:$0xff] %v2125_v12 }
 0x41d   :  { %2142 = vst [vmem:[#allocation5 + $0x68] sm:$0xff] %v2126_v18  ;;  %v2056_v42 = vmul.f32 %v2334_v59, %v2055_v28 }
 0x41f   :  { %v2060_v51 = vsel %vm2059_vm11, %v2334_v59, %v2056_v42 }
 0x420   :  { %v2075_v47 = vmul.f32 %v2060_v51, %v3577_v54  ;;  %v2076_v27 = vmul.f32 %v2060_v51, %v3580_v60 }
 0x422   :  { %v2101_v0 = vmul.f32 %v3440_v35, %v2075_v47  ;;  %v2102_v56 = vmul.f32 %v3457_v37, %v2076_v27 }
 0x424   :  { %v2127_v34 = vadd.f32 %v3465_v6, %v2101_v0  ;;  %v2128_v49 = vadd.f32 %v3467_v40, %v2102_v56 }
 0x426   :  { %2143 = vst [vmem:[#allocation5 + $0x70] sm:$0xff] %v2127_v34 }
 0x427   :  { %2144 = vst [vmem:[#allocation5 + $0x78] sm:$0xff] %v2128_v49 }
 0x428   :  { %2157 = dma.vmem_to_hbm [thread:$0]  %s2150_s16, 2048, %s2152_s19, [#allocation4], %s2404_s30, %s2404_s30, %s2405_s14  }
 0x429   :  { %2401 = dma.done.wait [#allocation4], 2048  }
 0x42a   :  { %2402 = vsyncadd [#allocation4], 4294965248 }
 0x42b   :  { %2162 = vsyncpa [#allocation3], 1 }
 0x42c   :  { %2163 = vsyncpa [#allocation4], 1 }

</bundles_post_ra>
